<compile_context>
chip_gen: v7x
topology: tpu7x:2x2x1
jax: 0.10.0
libtpu: 0.0.40
codegen_flags: <defaults>
</compile_context>

<pallas_src>
import numpy as np
import jax
import jax.numpy as jnp
from jax.experimental import pallas as pl
from jax.experimental.pallas import tpu as pltpu


# ----------------------------------------------------------------------------
# Pallas kernel: fused encoder layer + one-hot </s> gather + classifier head
# ----------------------------------------------------------------------------
def _layer_norm(x, gamma, beta, eps=1e-5):
    # two-pass variance E[(x - mean)^2]: cancellation-safe (perf review note).
    mean = jnp.mean(x, axis=-1, keepdims=True)
    xc = x - mean
    var = jnp.mean(xc * xc, axis=-1, keepdims=True)
    return xc * jax.lax.rsqrt(var + eps) * gamma + beta


def fused_encoder_classifier_kernel(
        onehot_ref,                                # (n_pad, B*S) bf16 one-hot gather matrix
        x_ref, pos_ref, mask_ref,                  # (BS, D) bf16, (BS, D) f32, (B, S) f32
        wq_ref, bq_ref, wk_ref, bk_ref, wv_ref, bv_ref, wo_ref, bo_ref,
        ln1g_ref, ln1b_ref, w1_ref, b1_ref, w2_ref, b2_ref, ln2g_ref, ln2b_ref,
        cw_ref, cb_ref,                            # classifier weight/bias (lane-padded)
        o_ref):                                    # (n_pad, C_pad) logits slab
    B, S = mask_ref.shape

    # Embedding + positional add fused into the kernel (f32 master copy).
    x = x_ref[...].astype(jnp.float32) + pos_ref[...]             # (BS, D) f32
    xb = x.astype(jnp.bfloat16)

    # QKV projections: bf16 MXU operands, f32 accumulation.
    # (1/sqrt(D) scale is pre-folded into wq/bq at init time.)
    q = jnp.dot(xb, wq_ref[...], preferred_element_type=jnp.float32) + bq_ref[...]
    k = jnp.dot(xb, wk_ref[...], preferred_element_type=jnp.float32) + bk_ref[...]
    v = jnp.dot(xb, wv_ref[...], preferred_element_type=jnp.float32) + bv_ref[...]
    qb = q.astype(jnp.bfloat16)
    kb = k.astype(jnp.bfloat16)
    vb = v.astype(jnp.bfloat16)

    # Additive attention bias from the padding mask (f32).
    bias = (1.0 - mask_ref[...]) * -1e9                           # (B, S)

    # Per-batch attention over static, tile-aligned S-row slices — everything
    # stays 2-D, no (B,S,D)<->(BS,D) relayout reshapes inside the kernel.
    # TODO(synk): replace with KV-tiled online softmax for real Longformer S.
    ctx_parts = []
    for b in range(B):                                            # static loop, B small
        lo, hi = b * S, (b + 1) * S
        s = jax.lax.dot_general(
            qb[lo:hi, :], kb[lo:hi, :],
            (((1,), (1,)), ((), ())),                             # q·kᵀ without XLU transpose
            preferred_element_type=jnp.float32)                   # (S, S) f32
        s = s + bias[b:b + 1, :]
        m = jnp.max(s, axis=-1, keepdims=True)
        p = jnp.exp(s - m)
        p = p * pl.reciprocal(jnp.sum(p, axis=-1, keepdims=True), approx=True)
        ctx_parts.append(jnp.dot(p.astype(jnp.bfloat16), vb[lo:hi, :],
                                 preferred_element_type=jnp.float32))  # (S, D) f32
    ctx = jnp.concatenate(ctx_parts, axis=0)                      # (BS, D) f32

    attn = jnp.dot(ctx.astype(jnp.bfloat16), wo_ref[...],
                   preferred_element_type=jnp.float32) + bo_ref[...]
    h = _layer_norm(x + attn, ln1g_ref[...], ln1b_ref[...])       # (BS, D) f32

    ff = jnp.dot(h.astype(jnp.bfloat16), w1_ref[...],
                 preferred_element_type=jnp.float32) + b1_ref[...]
    ff = jax.nn.gelu(ff, approximate=True)                        # tanh GELU (EUP)
    ff = jnp.dot(ff.astype(jnp.bfloat16), w2_ref[...],
                 preferred_element_type=jnp.float32) + b2_ref[...]
    h2 = _layer_norm(h + ff, ln2g_ref[...], ln2b_ref[...])        # (BS, D) f32

    # </s>-token gather as a one-hot MXU matmul (replaces the serial sublane
    # gather loop + VMEM staging scratch), feeding the classifier directly.
    e = jnp.dot(onehot_ref[...], h2.astype(jnp.bfloat16),
                preferred_element_type=jnp.float32)               # (n_pad, D) f32

    # Classifier head (eval-mode dropout = identity); lane-dense (C padded to 128)
    # output slab, sliced back to n_classes in the wrapper.
    o_ref[...] = (jnp.dot(e.astype(jnp.bfloat16), cw_ref[...],
                          preferred_element_type=jnp.float32) + cb_ref[...])


# ----------------------------------------------------------------------------
# Wrapper around pallas_call (grid-less: single invocation, no double-buffering)
# ----------------------------------------------------------------------------
def run_fused(one_hot, x_tok, pos, mask, params):
    n_pad = one_hot.shape[0]
    Cp = params["cls_w"].shape[1]

    operands = (
        one_hot, x_tok, pos, mask,
        params["wq"], params["bq"], params["wk"], params["bk"],
        params["wv"], params["bv"], params["wo"], params["bo"],
        params["ln1_g"], params["ln1_b"],
        params["w1"], params["b1"], params["w2"], params["b2"],
        params["ln2_g"], params["ln2_b"],
        params["cls_w"], params["cls_b"],
    )
    vmem_spec = pl.BlockSpec(memory_space=pltpu.MemorySpace.VMEM)

    # TODO(synk): at real Longformer sizes, add a "parallel" grid axis over
    # batch / q-tiles (v7x has 2 TensorCores) and re-derive vmem_limit_bytes.
    return pl.pallas_call(
        fused_encoder_classifier_kernel,
        out_shape=jax.ShapeDtypeStruct((n_pad, Cp), jnp.float32),
        in_specs=[vmem_spec] * len(operands),
        out_specs=vmem_spec,
        compiler_params=pltpu.CompilerParams(
            vmem_limit_bytes=32 * 1024 * 1024),
    )(*operands)


# ----------------------------------------------------------------------------
# Host-side sentence localization (mirrors the PyTorch forward's torch.nonzero;
# done on host-native ids so it never forces a device->host sync, and in a
# serving loop it is precomputed outside the launch loop).
# ----------------------------------------------------------------------------
def prepare_sentence_gather(ids_np, sep_id):
    B, S = ids_np.shape
    rows, cols = np.nonzero(ids_np == sep_id)          # row-major == PyTorch gather order
    n_sent = int(rows.shape[0])
    n_pad = max(8, -(-n_sent // 8) * 8)                # sublane-aligned sentence count

    flat = np.full((n_pad,), -1, np.int64)             # pad rows -> all-zero one-hot rows
    flat[:n_sent] = rows.astype(np.int64) * S + cols.astype(np.int64)
    one_hot = (flat[:, None] == np.arange(B * S)[None, :]).astype(np.float32)

    # global_attention_mask exactly as in the PyTorch forward (first token + </s>).
    # TODO(synk): not consumed — full-attention approximation makes it a no-op here.
    gmask = np.zeros((B, S), np.int32)
    gmask[:, 0] = 1
    gmask[rows, cols] = 1

    return jnp.asarray(one_hot, jnp.bfloat16), n_sent, gmask


# ----------------------------------------------------------------------------
# Full forward pass (mirrors SSClassifier_Cohan_Longformer.forward)
# ----------------------------------------------------------------------------
def forward(input_ids, attention_mask, one_hot, n_sent, params):
    B, S = input_ids.shape
    D = params["pos_emb"].shape[1]
    C = params["n_classes"]

    # Token-embedding lookup stays in XLA (glue); flattening to (BS, D) happens in
    # the wrapper so the kernel never relayouts 3D<->2D.
    x_tok = params["tok_emb"][input_ids].reshape(B * S, D)        # (BS, D) bf16
    pos = jnp.tile(params["pos_emb"][:S], (B, 1))                 # (BS, D) f32, param-derived
    mask = attention_mask.astype(jnp.float32)                     # (B, S)

    logits_pad = run_fused(one_hot, x_tok, pos, mask, params)
    return logits_pad[:n_sent, :C]


def init_params(key, vocab, max_seq, dim, ffn_dim, n_classes, n_classes_pad=128):
    ks = jax.random.split(key, 9)
    s = 0.02
    attn_scale = dim ** -0.5                 # folded into wq/bq (no in-kernel multiply)
    xavier = float(np.sqrt(6.0 / (dim + n_classes)))

    # torch.nn.init.xavier_uniform_ equivalent for the classifier weight,
    # zero-padded on the class axis to a full 128-lane slab.
    cls_w = jax.random.uniform(ks[8], (dim, n_classes), jnp.float32,
                               minval=-xavier, maxval=xavier)
    cls_w_pad = jnp.zeros((dim, n_classes_pad), jnp.float32).at[:, :n_classes].set(cls_w)

    def normal(k, shape):
        return jax.random.normal(k, shape, jnp.float32) * s

    return {
        "n_classes": n_classes,
        "tok_emb": normal(ks[0], (vocab, dim)).astype(jnp.bfloat16),
        "pos_emb": normal(ks[1], (max_seq, dim)),
        "wq": (normal(ks[2], (dim, dim)) * attn_scale).astype(jnp.bfloat16),
        "bq": jnp.zeros((1, dim), jnp.float32),        # scale fold is a no-op on zero bias
        "wk": normal(ks[3], (dim, dim)).astype(jnp.bfloat16),
        "bk": jnp.zeros((1, dim), jnp.float32),
        "wv": normal(ks[4], (dim, dim)).astype(jnp.bfloat16),
        "bv": jnp.zeros((1, dim), jnp.float32),
        "wo": normal(ks[5], (dim, dim)).astype(jnp.bfloat16),
        "bo": jnp.zeros((1, dim), jnp.float32),
        "ln1_g": jnp.ones((1, dim), jnp.float32), "ln1_b": jnp.zeros((1, dim), jnp.float32),
        "w1": normal(ks[6], (dim, ffn_dim)).astype(jnp.bfloat16),
        "b1": jnp.zeros((1, ffn_dim), jnp.float32),
        "w2": normal(ks[7], (ffn_dim, dim)).astype(jnp.bfloat16),
        "b2": jnp.zeros((1, dim), jnp.float32),
        "ln2_g": jnp.ones((1, dim), jnp.float32), "ln2_b": jnp.zeros((1, dim), jnp.float32),
        "cls_w": cls_w_pad.astype(jnp.bfloat16),
        "cls_b": jnp.zeros((1, n_classes_pad), jnp.float32),
    }


if __name__ == "__main__":
    key = jax.random.PRNGKey(0)

    # Hidden dim chosen lane-dense (128 = one lane width) per perf feedback;
    # batch / seq / classes / vocab kept small.
    B, S, D, C, V = 2, 16, 128, 4, 64
    FFN = 4 * D
    SEP_ID = 2                            # </s> token id
    BOS_ID = 1                            # <s>  token id

    k_ids, k_params = jax.random.split(key)
    ids_np = np.asarray(jax.random.randint(k_ids, (B, S), 3, V, dtype=jnp.int32)).copy()
    ids_np[:, 0] = BOS_ID
    ids_np[0, [5, 10, 15]] = SEP_ID       # 3 sentences in block 0
    ids_np[1, [7, 15]] = SEP_ID           # 2 sentences in block 1

    # Sentence localization on the host-native ids BEFORE upload: no per-call
    # device->host nonzero sync in the hot path.
    one_hot, n_sent, _gmask = prepare_sentence_gather(ids_np, SEP_ID)

    input_ids = jnp.asarray(ids_np, dtype=jnp.int32)
    attention_mask = jnp.ones((B, S), dtype=jnp.int32)
    params = init_params(k_params, V, S, D, FFN, C)

    logits = forward(input_ids, attention_mask, one_hot, n_sent, params)
    jax.block_until_ready(logits)

    assert logits.shape == (5, C), logits.shape   # 5 sentences total in batch
    print("KERNEL_OK")
</pallas_src>

<mosaic_0001>
module attributes {stable_mosaic.version = 11 : i64} {
  func.func @fused_encoder_classifier_kernel(%arg0: memref<8x32xbf16, #tpu.memory_space<vmem>>, %arg1: memref<32x128xbf16, #tpu.memory_space<vmem>>, %arg2: memref<32x128xf32, #tpu.memory_space<vmem>>, %arg3: memref<2x16xf32, #tpu.memory_space<vmem>>, %arg4: memref<128x128xbf16, #tpu.memory_space<vmem>>, %arg5: memref<1x128xf32, #tpu.memory_space<vmem>>, %arg6: memref<128x128xbf16, #tpu.memory_space<vmem>>, %arg7: memref<1x128xf32, #tpu.memory_space<vmem>>, %arg8: memref<128x128xbf16, #tpu.memory_space<vmem>>, %arg9: memref<1x128xf32, #tpu.memory_space<vmem>>, %arg10: memref<128x128xbf16, #tpu.memory_space<vmem>>, %arg11: memref<1x128xf32, #tpu.memory_space<vmem>>, %arg12: memref<1x128xf32, #tpu.memory_space<vmem>>, %arg13: memref<1x128xf32, #tpu.memory_space<vmem>>, %arg14: memref<128x512xbf16, #tpu.memory_space<vmem>>, %arg15: memref<1x512xf32, #tpu.memory_space<vmem>>, %arg16: memref<512x128xbf16, #tpu.memory_space<vmem>>, %arg17: memref<1x128xf32, #tpu.memory_space<vmem>>, %arg18: memref<1x128xf32, #tpu.memory_space<vmem>>, %arg19: memref<1x128xf32, #tpu.memory_space<vmem>>, %arg20: memref<128x128xbf16, #tpu.memory_space<vmem>>, %arg21: memref<1x128xf32, #tpu.memory_space<vmem>>, %arg22: memref<8x128xf32, #tpu.memory_space<vmem>>) attributes {dimension_semantics = [], scalar_prefetch = 0 : i64, scratch_operands = 0 : i64, tpu.core_type = #tpu.core_type<tc>} {
    %c0 = arith.constant 0 : index
    %c0_0 = arith.constant 0 : index
    %0 = vector.load %arg1[%c0, %c0_0] : memref<32x128xbf16, #tpu.memory_space<vmem>>, vector<32x128xbf16>
    %1 = arith.extf %0 : vector<32x128xbf16> to vector<32x128xf32>
    %c0_1 = arith.constant 0 : index
    %c0_2 = arith.constant 0 : index
    %2 = vector.load %arg2[%c0_1, %c0_2] : memref<32x128xf32, #tpu.memory_space<vmem>>, vector<32x128xf32>
    %3 = arith.addf %1, %2 : vector<32x128xf32>
    %4 = arith.truncf %3 : vector<32x128xf32> to vector<32x128xbf16>
    %c0_3 = arith.constant 0 : index
    %c0_4 = arith.constant 0 : index
    %5 = vector.load %arg4[%c0_3, %c0_4] : memref<128x128xbf16, #tpu.memory_space<vmem>>, vector<128x128xbf16>
    %cst = arith.constant dense<0.000000e+00> : vector<32x128xf32>
    %6 = tpu.matmul %4, %5, %cst {dimension_numbers = #tpu.dot_dimension_numbers<[1], [0], [0], [1], [0, 0, 1, 1], [], []>} : vector<32x128xbf16>, vector<128x128xbf16>, vector<32x128xf32> -> vector<32x128xf32>
    %c0_5 = arith.constant 0 : index
    %c0_6 = arith.constant 0 : index
    %7 = vector.load %arg5[%c0_5, %c0_6] : memref<1x128xf32, #tpu.memory_space<vmem>>, vector<1x128xf32>
    %8 = vector.broadcast %7 : vector<1x128xf32> to vector<32x128xf32>
    %9 = arith.addf %6, %8 : vector<32x128xf32>
    %c0_7 = arith.constant 0 : index
    %c0_8 = arith.constant 0 : index
    %10 = vector.load %arg6[%c0_7, %c0_8] : memref<128x128xbf16, #tpu.memory_space<vmem>>, vector<128x128xbf16>
    %cst_9 = arith.constant dense<0.000000e+00> : vector<32x128xf32>
    %11 = tpu.matmul %4, %10, %cst_9 {dimension_numbers = #tpu.dot_dimension_numbers<[1], [0], [0], [1], [0, 0, 1, 1], [], []>} : vector<32x128xbf16>, vector<128x128xbf16>, vector<32x128xf32> -> vector<32x128xf32>
    %c0_10 = arith.constant 0 : index
    %c0_11 = arith.constant 0 : index
    %12 = vector.load %arg7[%c0_10, %c0_11] : memref<1x128xf32, #tpu.memory_space<vmem>>, vector<1x128xf32>
    %13 = vector.broadcast %12 : vector<1x128xf32> to vector<32x128xf32>
    %14 = arith.addf %11, %13 : vector<32x128xf32>
    %c0_12 = arith.constant 0 : index
    %c0_13 = arith.constant 0 : index
    %15 = vector.load %arg8[%c0_12, %c0_13] : memref<128x128xbf16, #tpu.memory_space<vmem>>, vector<128x128xbf16>
    %cst_14 = arith.constant dense<0.000000e+00> : vector<32x128xf32>
    %16 = tpu.matmul %4, %15, %cst_14 {dimension_numbers = #tpu.dot_dimension_numbers<[1], [0], [0], [1], [0, 0, 1, 1], [], []>} : vector<32x128xbf16>, vector<128x128xbf16>, vector<32x128xf32> -> vector<32x128xf32>
    %c0_15 = arith.constant 0 : index
    %c0_16 = arith.constant 0 : index
    %17 = vector.load %arg9[%c0_15, %c0_16] : memref<1x128xf32, #tpu.memory_space<vmem>>, vector<1x128xf32>
    %18 = vector.broadcast %17 : vector<1x128xf32> to vector<32x128xf32>
    %19 = arith.addf %16, %18 : vector<32x128xf32>
    %20 = arith.truncf %9 : vector<32x128xf32> to vector<32x128xbf16>
    %21 = arith.truncf %14 : vector<32x128xf32> to vector<32x128xbf16>
    %22 = arith.truncf %19 : vector<32x128xf32> to vector<32x128xbf16>
    %c0_17 = arith.constant 0 : index
    %c0_18 = arith.constant 0 : index
    %23 = vector.load %arg3[%c0_17, %c0_18] : memref<2x16xf32, #tpu.memory_space<vmem>>, vector<2x16xf32>
    %cst_19 = arith.constant 1.000000e+00 : f32
    %24 = vector.broadcast %cst_19 : f32 to vector<2x16xf32>
    %25 = arith.subf %24, %23 : vector<2x16xf32>
    %cst_20 = arith.constant -1.000000e+09 : f32
    %26 = vector.broadcast %cst_20 : f32 to vector<2x16xf32>
    %27 = arith.mulf %25, %26 : vector<2x16xf32>
    %28 = vector.extract_strided_slice %20 {offsets = [0, 0], sizes = [16, 128], strides = [1, 1]} : vector<32x128xbf16> to vector<16x128xbf16>
    %29 = vector.extract_strided_slice %21 {offsets = [0, 0], sizes = [16, 128], strides = [1, 1]} : vector<32x128xbf16> to vector<16x128xbf16>
    %cst_21 = arith.constant dense<0.000000e+00> : vector<16x16xf32>
    %30 = tpu.matmul %28, %29, %cst_21 {dimension_numbers = #tpu.dot_dimension_numbers<[1], [1], [0], [0], [0, 0, 1, 0], [], []>} : vector<16x128xbf16>, vector<16x128xbf16>, vector<16x16xf32> -> vector<16x16xf32>
    %31 = vector.extract_strided_slice %27 {offsets = [0, 0], sizes = [1, 16], strides = [1, 1]} : vector<2x16xf32> to vector<1x16xf32>
    %32 = vector.broadcast %31 : vector<1x16xf32> to vector<16x16xf32>
    %33 = arith.addf %30, %32 : vector<16x16xf32>
    %cst_22 = arith.constant dense<0xFF800000> : vector<16xf32>
    %34 = vector.multi_reduction <maximumf>, %33, %cst_22 [1] : vector<16x16xf32> to vector<16xf32>
    %35 = vector.shape_cast %34 : vector<16xf32> to vector<16x1xf32>
    %36 = vector.broadcast %35 : vector<16x1xf32> to vector<16x16xf32>
    %37 = arith.subf %33, %36 : vector<16x16xf32>
    %38 = math.exp %37 : vector<16x16xf32>
    %cst_23 = arith.constant dense<0.000000e+00> : vector<16xf32>
    %39 = vector.multi_reduction <add>, %38, %cst_23 [1] : vector<16x16xf32> to vector<16xf32>
    %40 = vector.shape_cast %39 : vector<16xf32> to vector<16x1xf32>
    %41 = tpu.reciprocal %40 {approx = true} : vector<16x1xf32> -> vector<16x1xf32>
    %42 = vector.broadcast %41 : vector<16x1xf32> to vector<16x16xf32>
    %43 = arith.mulf %38, %42 : vector<16x16xf32>
    %44 = arith.truncf %43 : vector<16x16xf32> to vector<16x16xbf16>
    %45 = vector.extract_strided_slice %22 {offsets = [0, 0], sizes = [16, 128], strides = [1, 1]} : vector<32x128xbf16> to vector<16x128xbf16>
    %cst_24 = arith.constant dense<0.000000e+00> : vector<16x128xf32>
    %46 = tpu.matmul %44, %45, %cst_24 {dimension_numbers = #tpu.dot_dimension_numbers<[1], [0], [0], [1], [0, 0, 1, 1], [], []>} : vector<16x16xbf16>, vector<16x128xbf16>, vector<16x128xf32> -> vector<16x128xf32>
    %47 = vector.extract_strided_slice %20 {offsets = [16, 0], sizes = [16, 128], strides = [1, 1]} : vector<32x128xbf16> to vector<16x128xbf16>
    %48 = vector.extract_strided_slice %21 {offsets = [16, 0], sizes = [16, 128], strides = [1, 1]} : vector<32x128xbf16> to vector<16x128xbf16>
    %cst_25 = arith.constant dense<0.000000e+00> : vector<16x16xf32>
    %49 = tpu.matmul %47, %48, %cst_25 {dimension_numbers = #tpu.dot_dimension_numbers<[1], [1], [0], [0], [0, 0, 1, 0], [], []>} : vector<16x128xbf16>, vector<16x128xbf16>, vector<16x16xf32> -> vector<16x16xf32>
    %50 = vector.extract_strided_slice %27 {offsets = [1, 0], sizes = [1, 16], strides = [1, 1]} : vector<2x16xf32> to vector<1x16xf32>
    %51 = vector.broadcast %50 : vector<1x16xf32> to vector<16x16xf32>
    %52 = arith.addf %49, %51 : vector<16x16xf32>
    %cst_26 = arith.constant dense<0xFF800000> : vector<16xf32>
    %53 = vector.multi_reduction <maximumf>, %52, %cst_26 [1] : vector<16x16xf32> to vector<16xf32>
    %54 = vector.shape_cast %53 : vector<16xf32> to vector<16x1xf32>
    %55 = vector.broadcast %54 : vector<16x1xf32> to vector<16x16xf32>
    %56 = arith.subf %52, %55 : vector<16x16xf32>
    %57 = math.exp %56 : vector<16x16xf32>
    %cst_27 = arith.constant dense<0.000000e+00> : vector<16xf32>
    %58 = vector.multi_reduction <add>, %57, %cst_27 [1] : vector<16x16xf32> to vector<16xf32>
    %59 = vector.shape_cast %58 : vector<16xf32> to vector<16x1xf32>
    %60 = tpu.reciprocal %59 {approx = true} : vector<16x1xf32> -> vector<16x1xf32>
    %61 = vector.broadcast %60 : vector<16x1xf32> to vector<16x16xf32>
    %62 = arith.mulf %57, %61 : vector<16x16xf32>
    %63 = arith.truncf %62 : vector<16x16xf32> to vector<16x16xbf16>
    %64 = vector.extract_strided_slice %22 {offsets = [16, 0], sizes = [16, 128], strides = [1, 1]} : vector<32x128xbf16> to vector<16x128xbf16>
    %cst_28 = arith.constant dense<0.000000e+00> : vector<16x128xf32>
    %65 = tpu.matmul %63, %64, %cst_28 {dimension_numbers = #tpu.dot_dimension_numbers<[1], [0], [0], [1], [0, 0, 1, 1], [], []>} : vector<16x16xbf16>, vector<16x128xbf16>, vector<16x128xf32> -> vector<16x128xf32>
    %66 = tpu.concatenate %46, %65 in 0 : vector<16x128xf32>, vector<16x128xf32> -> vector<32x128xf32>
    %67 = arith.truncf %66 : vector<32x128xf32> to vector<32x128xbf16>
    %c0_29 = arith.constant 0 : index
    %c0_30 = arith.constant 0 : index
    %68 = vector.load %arg10[%c0_29, %c0_30] : memref<128x128xbf16, #tpu.memory_space<vmem>>, vector<128x128xbf16>
    %cst_31 = arith.constant dense<0.000000e+00> : vector<32x128xf32>
    %69 = tpu.matmul %67, %68, %cst_31 {dimension_numbers = #tpu.dot_dimension_numbers<[1], [0], [0], [1], [0, 0, 1, 1], [], []>} : vector<32x128xbf16>, vector<128x128xbf16>, vector<32x128xf32> -> vector<32x128xf32>
    %c0_32 = arith.constant 0 : index
    %c0_33 = arith.constant 0 : index
    %70 = vector.load %arg11[%c0_32, %c0_33] : memref<1x128xf32, #tpu.memory_space<vmem>>, vector<1x128xf32>
    %71 = vector.broadcast %70 : vector<1x128xf32> to vector<32x128xf32>
    %72 = arith.addf %69, %71 : vector<32x128xf32>
    %73 = arith.addf %3, %72 : vector<32x128xf32>
    %c0_34 = arith.constant 0 : index
    %c0_35 = arith.constant 0 : index
    %74 = vector.load %arg12[%c0_34, %c0_35] : memref<1x128xf32, #tpu.memory_space<vmem>>, vector<1x128xf32>
    %c0_36 = arith.constant 0 : index
    %c0_37 = arith.constant 0 : index
    %75 = vector.load %arg13[%c0_36, %c0_37] : memref<1x128xf32, #tpu.memory_space<vmem>>, vector<1x128xf32>
    %cst_38 = arith.constant dense<0.000000e+00> : vector<32xf32>
    %76 = vector.multi_reduction <add>, %73, %cst_38 [1] : vector<32x128xf32> to vector<32xf32>
    %77 = vector.shape_cast %76 : vector<32xf32> to vector<32x1xf32>
    %cst_39 = arith.constant 1.280000e+02 : f32
    %78 = vector.broadcast %cst_39 : f32 to vector<32x1xf32>
    %79 = arith.divf %77, %78 : vector<32x1xf32>
    %80 = vector.broadcast %79 : vector<32x1xf32> to vector<32x128xf32>
    %81 = arith.subf %73, %80 : vector<32x128xf32>
    %82 = arith.mulf %81, %81 : vector<32x128xf32>
    %cst_40 = arith.constant dense<0.000000e+00> : vector<32xf32>
    %83 = vector.multi_reduction <add>, %82, %cst_40 [1] : vector<32x128xf32> to vector<32xf32>
    %84 = vector.shape_cast %83 : vector<32xf32> to vector<32x1xf32>
    %cst_41 = arith.constant 1.280000e+02 : f32
    %85 = vector.broadcast %cst_41 : f32 to vector<32x1xf32>
    %86 = arith.divf %84, %85 : vector<32x1xf32>
    %cst_42 = arith.constant 9.99999974E-6 : f32
    %87 = vector.broadcast %cst_42 : f32 to vector<32x1xf32>
    %88 = arith.addf %86, %87 : vector<32x1xf32>
    %89 = math.rsqrt %88 : vector<32x1xf32>
    %90 = vector.broadcast %89 : vector<32x1xf32> to vector<32x128xf32>
    %91 = arith.mulf %81, %90 : vector<32x128xf32>
    %92 = vector.broadcast %74 : vector<1x128xf32> to vector<32x128xf32>
    %93 = arith.mulf %91, %92 : vector<32x128xf32>
    %94 = vector.broadcast %75 : vector<1x128xf32> to vector<32x128xf32>
    %95 = arith.addf %93, %94 : vector<32x128xf32>
    %96 = arith.truncf %95 : vector<32x128xf32> to vector<32x128xbf16>
    %c0_43 = arith.constant 0 : index
    %c0_44 = arith.constant 0 : index
    %97 = vector.load %arg14[%c0_43, %c0_44] : memref<128x512xbf16, #tpu.memory_space<vmem>>, vector<128x512xbf16>
    %cst_45 = arith.constant dense<0.000000e+00> : vector<32x512xf32>
    %98 = tpu.matmul %96, %97, %cst_45 {dimension_numbers = #tpu.dot_dimension_numbers<[1], [0], [0], [1], [0, 0, 1, 1], [], []>} : vector<32x128xbf16>, vector<128x512xbf16>, vector<32x512xf32> -> vector<32x512xf32>
    %c0_46 = arith.constant 0 : index
    %c0_47 = arith.constant 0 : index
    %99 = vector.load %arg15[%c0_46, %c0_47] : memref<1x512xf32, #tpu.memory_space<vmem>>, vector<1x512xf32>
    %100 = vector.broadcast %99 : vector<1x512xf32> to vector<32x512xf32>
    %101 = arith.addf %98, %100 : vector<32x512xf32>
    %102 = arith.mulf %101, %101 : vector<32x512xf32>
    %103 = arith.mulf %101, %102 : vector<32x512xf32>
    %cst_48 = arith.constant 4.471500e-02 : f32
    %104 = vector.broadcast %cst_48 : f32 to vector<32x512xf32>
    %105 = arith.mulf %104, %103 : vector<32x512xf32>
    %106 = arith.addf %101, %105 : vector<32x512xf32>
    %cst_49 = arith.constant 0.797884583 : f32
    %107 = vector.broadcast %cst_49 : f32 to vector<32x512xf32>
    %108 = arith.mulf %107, %106 : vector<32x512xf32>
    %109 = math.tanh %108 : vector<32x512xf32>
    %cst_50 = arith.constant 1.000000e+00 : f32
    %110 = vector.broadcast %cst_50 : f32 to vector<32x512xf32>
    %111 = arith.addf %110, %109 : vector<32x512xf32>
    %cst_51 = arith.constant 5.000000e-01 : f32
    %112 = vector.broadcast %cst_51 : f32 to vector<32x512xf32>
    %113 = arith.mulf %112, %111 : vector<32x512xf32>
    %114 = arith.mulf %101, %113 : vector<32x512xf32>
    %115 = arith.truncf %114 : vector<32x512xf32> to vector<32x512xbf16>
    %c0_52 = arith.constant 0 : index
    %c0_53 = arith.constant 0 : index
    %116 = vector.load %arg16[%c0_52, %c0_53] : memref<512x128xbf16, #tpu.memory_space<vmem>>, vector<512x128xbf16>
    %cst_54 = arith.constant dense<0.000000e+00> : vector<32x128xf32>
    %117 = tpu.matmul %115, %116, %cst_54 {dimension_numbers = #tpu.dot_dimension_numbers<[1], [0], [0], [1], [0, 0, 1, 1], [], []>} : vector<32x512xbf16>, vector<512x128xbf16>, vector<32x128xf32> -> vector<32x128xf32>
    %c0_55 = arith.constant 0 : index
    %c0_56 = arith.constant 0 : index
    %118 = vector.load %arg17[%c0_55, %c0_56] : memref<1x128xf32, #tpu.memory_space<vmem>>, vector<1x128xf32>
    %119 = vector.broadcast %118 : vector<1x128xf32> to vector<32x128xf32>
    %120 = arith.addf %117, %119 : vector<32x128xf32>
    %121 = arith.addf %95, %120 : vector<32x128xf32>
    %c0_57 = arith.constant 0 : index
    %c0_58 = arith.constant 0 : index
    %122 = vector.load %arg18[%c0_57, %c0_58] : memref<1x128xf32, #tpu.memory_space<vmem>>, vector<1x128xf32>
    %c0_59 = arith.constant 0 : index
    %c0_60 = arith.constant 0 : index
    %123 = vector.load %arg19[%c0_59, %c0_60] : memref<1x128xf32, #tpu.memory_space<vmem>>, vector<1x128xf32>
    %cst_61 = arith.constant dense<0.000000e+00> : vector<32xf32>
    %124 = vector.multi_reduction <add>, %121, %cst_61 [1] : vector<32x128xf32> to vector<32xf32>
    %125 = vector.shape_cast %124 : vector<32xf32> to vector<32x1xf32>
    %cst_62 = arith.constant 1.280000e+02 : f32
    %126 = vector.broadcast %cst_62 : f32 to vector<32x1xf32>
    %127 = arith.divf %125, %126 : vector<32x1xf32>
    %128 = vector.broadcast %127 : vector<32x1xf32> to vector<32x128xf32>
    %129 = arith.subf %121, %128 : vector<32x128xf32>
    %130 = arith.mulf %129, %129 : vector<32x128xf32>
    %cst_63 = arith.constant dense<0.000000e+00> : vector<32xf32>
    %131 = vector.multi_reduction <add>, %130, %cst_63 [1] : vector<32x128xf32> to vector<32xf32>
    %132 = vector.shape_cast %131 : vector<32xf32> to vector<32x1xf32>
    %cst_64 = arith.constant 1.280000e+02 : f32
    %133 = vector.broadcast %cst_64 : f32 to vector<32x1xf32>
    %134 = arith.divf %132, %133 : vector<32x1xf32>
    %cst_65 = arith.constant 9.99999974E-6 : f32
    %135 = vector.broadcast %cst_65 : f32 to vector<32x1xf32>
    %136 = arith.addf %134, %135 : vector<32x1xf32>
    %137 = math.rsqrt %136 : vector<32x1xf32>
    %138 = vector.broadcast %137 : vector<32x1xf32> to vector<32x128xf32>
    %139 = arith.mulf %129, %138 : vector<32x128xf32>
    %140 = vector.broadcast %122 : vector<1x128xf32> to vector<32x128xf32>
    %141 = arith.mulf %139, %140 : vector<32x128xf32>
    %142 = vector.broadcast %123 : vector<1x128xf32> to vector<32x128xf32>
    %143 = arith.addf %141, %142 : vector<32x128xf32>
    %c0_66 = arith.constant 0 : index
    %c0_67 = arith.constant 0 : index
    %144 = vector.load %arg0[%c0_66, %c0_67] : memref<8x32xbf16, #tpu.memory_space<vmem>>, vector<8x32xbf16>
    %145 = arith.truncf %143 : vector<32x128xf32> to vector<32x128xbf16>
    %cst_68 = arith.constant dense<0.000000e+00> : vector<8x128xf32>
    %146 = tpu.matmul %144, %145, %cst_68 {dimension_numbers = #tpu.dot_dimension_numbers<[1], [0], [0], [1], [0, 0, 1, 1], [], []>} : vector<8x32xbf16>, vector<32x128xbf16>, vector<8x128xf32> -> vector<8x128xf32>
    %147 = arith.truncf %146 : vector<8x128xf32> to vector<8x128xbf16>
    %c0_69 = arith.constant 0 : index
    %c0_70 = arith.constant 0 : index
    %148 = vector.load %arg20[%c0_69, %c0_70] : memref<128x128xbf16, #tpu.memory_space<vmem>>, vector<128x128xbf16>
    %cst_71 = arith.constant dense<0.000000e+00> : vector<8x128xf32>
    %149 = tpu.matmul %147, %148, %cst_71 {dimension_numbers = #tpu.dot_dimension_numbers<[1], [0], [0], [1], [0, 0, 1, 1], [], []>} : vector<8x128xbf16>, vector<128x128xbf16>, vector<8x128xf32> -> vector<8x128xf32>
    %c0_72 = arith.constant 0 : index
    %c0_73 = arith.constant 0 : index
    %150 = vector.load %arg21[%c0_72, %c0_73] : memref<1x128xf32, #tpu.memory_space<vmem>>, vector<1x128xf32>
    %151 = vector.broadcast %150 : vector<1x128xf32> to vector<8x128xf32>
    %152 = arith.addf %149, %151 : vector<8x128xf32>
    %c0_74 = arith.constant 0 : index
    %c0_75 = arith.constant 0 : index
    %153 = vector.load %arg22[%c0_74, %c0_75] : memref<8x128xf32, #tpu.memory_space<vmem>>, vector<8x128xf32>
    tpu.vector_store %arg22[%c0_74, %c0_75], %152 {strides = array<i32>} : memref<8x128xf32, #tpu.memory_space<vmem>>, vector<8x128xf32>,
    return
  }
}

</mosaic_0001>

<bundles_post_ra>
// kernel: tpu_custom_call.1
= control target key start
LH: loop header
LB: loop body
LE: loop exit
PB: predicated region body
PF: predicated region fallthrough
CT: control target
= control target key end

     0   :  { %s3674_s0 = inlined_call_operand.hbm [shape: bf16[8,32], index: 0, kind: input, shape index: {}]   ;;  %s3675_s1 = inlined_call_operand.hbm [shape: bf16[32,128], index: 1, kind: input, shape index: {}]   ;;  %s3676_s2 = inlined_call_operand.hbm [shape: f32[32,128], index: 2, kind: input, shape index: {}]   ;;  %s3677_s3 = inlined_call_operand.vmem [shape: f32[2,16], index: 3, kind: input, shape index: {}]   ;;  %s3678_s4 = inlined_call_operand.hbm [shape: bf16[128,128], index: 4, kind: input, shape index: {}]   ;;  %s3679_s5 = inlined_call_operand.vmem [shape: f32[1,128], index: 5, kind: input, shape index: {}]   ;;  %s3680_s6 = inlined_call_operand.hbm [shape: bf16[128,128], index: 6, kind: input, shape index: {}]   ;;  %s3681_s7 = inlined_call_operand.vmem [shape: f32[1,128], index: 7, kind: input, shape index: {}]   ;;  %s3682_s8 = inlined_call_operand.hbm [shape: bf16[128,128], index: 8, kind: input, shape index: {}]   ;;  %s3683_s9 = inlined_call_operand.vmem [shape: f32[1,128], index: 9, kind: input, shape index: {}]   ;;  %s3684_s10 = inlined_call_operand.hbm [shape: bf16[128,128], index: 10, kind: input, shape index: {}]   ;;  %s3685_s11 = inlined_call_operand.vmem [shape: f32[1,128], index: 11, kind: input, shape index: {}]   ;;  %s3686_s12 = inlined_call_operand.vmem [shape: f32[1,128], index: 12, kind: input, shape index: {}]   ;;  %s3687_s13 = inlined_call_operand.hbm [shape: f32[1,128], index: 13, kind: input, shape index: {}]   ;;  %s3688_s14 = inlined_call_operand.hbm [shape: bf16[128,512], index: 14, kind: input, shape index: {}]   ;;  %s3689_s15 = inlined_call_operand.vmem [shape: f32[1,512], index: 15, kind: input, shape index: {}]   ;;  %s3690_s16 = inlined_call_operand.hbm [shape: bf16[512,128], index: 16, kind: input, shape index: {}]   ;;  %s3691_s17 = inlined_call_operand.hbm [shape: f32[1,128], index: 17, kind: input, shape index: {}]   ;;  %s3692_s18 = inlined_call_operand.hbm [shape: f32[1,128], index: 18, kind: input, shape index: {}]   ;;  %s3693_s19 = inlined_call_operand.hbm [shape: f32[1,128], index: 19, kind: input, shape index: {}]   ;;  %s3694_s20 = inlined_call_operand.vmem [shape: bf16[128,128], index: 20, kind: input, shape index: {}]   ;;  %s3695_s21 = inlined_call_operand.vmem [shape: f32[1,128], index: 21, kind: input, shape index: {}]   ;;  %s3696_s22 = inlined_call_operand.hbm [shape: f32[8,128], index: 22, kind: output, shape index: {}]  }
   0x1   :  { %3704 = sst [smem:[#allocation32_spill]] %s3674_s0 }
   0x2   :  { %3705 = sst [smem:[#allocation33_spill]] %s3675_s1 }
   0x3   :  { %3706 = sst [smem:[#allocation34_spill]] %s3676_s2 }
   0x4   :  { %3707 = sst [smem:[#allocation35_spill]] %s3677_s3 }
   0x5   :  { %3708 = sst [smem:[#allocation36_spill]] %s3678_s4 }
   0x6   :  { %3709 = sst [smem:[#allocation37_spill]] %s3679_s5 }
   0x7   :  { %3710 = sst [smem:[#allocation38_spill]] %s3680_s6 }
   0x8   :  { %3711 = sst [smem:[#allocation39_spill]] %s3694_s20 }
   0x9   :  { %3712 = sst [smem:[#allocation40_spill]] %s3695_s21 }
   0xa   :  { %3713 = sst [smem:[#allocation41_spill]] %s3696_s22 }
   0xb   :  { %27 = vsyncpa [#allocation3], 0 }
   0xc   :  { %28 = vsyncpa [#allocation6], 0 }
   0xd   :  { %29 = vsyncpa [#allocation9], 0 }
   0xe   :  { %30 = vsyncpa [#allocation12], 0 }
   0xf   :  { %31 = vsyncpa [#allocation15], 0 }
  0x10   :  { %32 = vsyncpa [#allocation18], 0 }
  0x11   :  { %33 = vsyncpa [#allocation21], 0 }
  0x12   :  { %34 = vsyncpa [#allocation4], 0  ;;  %s3035_s3 = smov [#allocation5]   ;;  %s3714_s4 = sld [smem:[#allocation33_spill]] }
  0x13   :  { %s50_s28 = sshll.u32 %s3035_s3, 4  ;;  %s51_s28 = int_to_ptr.vmem [resolvable:$true] %s50_s28 }
  0x18   :  { %s2711_s0 = scalar_lea.hbm %s3714_s4, 256 }
  0x19   :  { %p2712_p0 = scmp.ne.s32.totalorder %s3714_s4, %s2711_s0  ;;  %p2715_p1 = scmp.lt.u32.totalorder %s2711_s0, %s3714_s4 }
  0x1b   :  { %p2717_p2 = pnand %p2715_p1, %p2712_p0 }
  0x1d   :  { %2720 = shalt.err (!%p2717_p2)
}
  0x1e   :  { %s2721_s6 = scalar_lea.vmem %s51_s28, 256  ;;  %p2726_p4 = scmp.lt.s32.totalorder %s51_s28, %s51_s28 }
  0x1f   :  { %p2722_p3 = scmp.ne.s32.totalorder %s51_s28, %s2721_s6  ;;  %p2727_p5 = scmp.lt.s32.totalorder %s2721_s6, %s2721_s6 }
  0x21   :  { %p2728_p6 = por %p2727_p5, %p2726_p4 }
  0x23   :  { %p2729_p7 = pnand %p2728_p6, %p2722_p3 }
  0x25   :  { %2732 = shalt.err (!%p2729_p7)
}
  0x26   :  { %s3036_s25 = smov 64   ;;  %s3037_s26 = smov 4  }
  0x27   :  { %56 = dma.hbm_to_vmem [thread:$0]  %s3714_s4, 256, %s51_s28, [#allocation6], %s3036_s25, %s3036_s25, %s3037_s26  }
  0x28   :  { %s3038_s3 = smov [#allocation8]   ;;  %s3039_s30 = smov [#allocation11]  }
  0x29   :  { %s76_s29 = sshll.u32 %s3038_s3, 4  ;;  %s104_s0 = sshll.u32 %s3039_s30, 4  ;;  %s77_s29 = int_to_ptr.vmem [resolvable:$true] %s76_s29  ;;  %s105_s0 = int_to_ptr.vmem [resolvable:$true] %s104_s0 }
  0x2a   :  { %s3715_s5 = sld [smem:[#allocation36_spill]] }
  0x30   :  { %s2733_s24 = scalar_lea.hbm %s3715_s5, 1024 }
  0x31   :  { %p2734_p8 = scmp.ne.s32.totalorder %s3715_s5, %s2733_s24  ;;  %p2737_p9 = scmp.lt.u32.totalorder %s2733_s24, %s3715_s5 }
  0x33   :  { %p2739_p10 = pnand %p2737_p9, %p2734_p8 }
  0x35   :  { %2742 = shalt.err (!%p2739_p10)
}
  0x36   :  { %s2743_s28 = scalar_lea.vmem %s77_s29, 1024  ;;  %p2748_p12 = scmp.lt.s32.totalorder %s77_s29, %s77_s29 }
  0x37   :  { %p2744_p11 = scmp.ne.s32.totalorder %s77_s29, %s2743_s28  ;;  %p2749_p13 = scmp.lt.s32.totalorder %s2743_s28, %s2743_s28 }
  0x39   :  { %p2750_p0 = por %p2749_p13, %p2748_p12 }
  0x3b   :  { %p2751_p1 = pnand %p2750_p0, %p2744_p11 }
  0x3d   :  { %2754 = shalt.err (!%p2751_p1)
}
  0x3e   :  { %82 = dma.hbm_to_vmem [thread:$0]  %s3715_s5, 1024, %s77_s29, [#allocation9], %s3036_s25, %s3036_s25, %s3037_s26  }
  0x3f   :  { %s2755_s21 = scalar_lea.hbm %s3682_s8, 1024 }
  0x40   :  { %p2756_p2 = scmp.ne.s32.totalorder %s3682_s8, %s2755_s21  ;;  %p2759_p3 = scmp.lt.u32.totalorder %s2755_s21, %s3682_s8 }
  0x42   :  { %p2761_p4 = pnand %p2759_p3, %p2756_p2 }
  0x44   :  { %2764 = shalt.err (!%p2761_p4)
}
  0x45   :  { %s2765_s1 = scalar_lea.vmem %s105_s0, 1024  ;;  %p2770_p6 = scmp.lt.s32.totalorder %s105_s0, %s105_s0 }
  0x46   :  { %p2766_p5 = scmp.ne.s32.totalorder %s105_s0, %s2765_s1  ;;  %p2771_p7 = scmp.lt.s32.totalorder %s2765_s1, %s2765_s1 }
  0x48   :  { %p2772_p8 = por %p2771_p7, %p2770_p6 }
  0x4a   :  { %p2773_p9 = pnand %p2772_p8, %p2766_p5 }
  0x4c   :  { %2776 = shalt.err (!%p2773_p9)
}
  0x4d   :  { %110 = dma.hbm_to_vmem [thread:$0]  %s3682_s8, 1024, %s105_s0, [#allocation12], %s3036_s25, %s3036_s25, %s3037_s26  }
  0x4e   :  { %s3040_s24 = smov [#allocation14]   ;;  %s3041_s28 = smov [#allocation17]  }
  0x4f   :  { %s135_s6 = sshll.u32 %s3040_s24, 4  ;;  %s158_s4 = sshll.u32 %s3041_s28, 4  ;;  %s136_s6 = int_to_ptr.vmem [resolvable:$true] %s135_s6  ;;  %s159_s4 = int_to_ptr.vmem [resolvable:$true] %s158_s4 }
  0x50   :  { %s2777_s20 = scalar_lea.hbm %s3687_s13, 16 }
  0x51   :  { %p2778_p10 = scmp.ne.s32.totalorder %s3687_s13, %s2777_s20  ;;  %p2781_p11 = scmp.lt.u32.totalorder %s2777_s20, %s3687_s13 }
  0x53   :  { %p2783_p12 = pnand %p2781_p11, %p2778_p10 }
  0x55   :  { %2786 = shalt.err (!%p2783_p12)
}
  0x56   :  { %s2787_s8 = scalar_lea.vmem %s136_s6, 16  ;;  %s2791_s0 = scalar_lea.vmem %s136_s6, 32 }
  0x57   :  { %p2788_p13 = scmp.ne.s32.totalorder %s136_s6, %s2787_s8  ;;  %p2792_p0 = scmp.lt.s32.totalorder %s136_s6, %s136_s6 }
  0x58   :  { %p2793_p1 = scmp.lt.s32.totalorder %s2791_s0, %s2787_s8 }
  0x5a   :  { %p2794_p2 = por %p2793_p1, %p2792_p0 }
  0x5c   :  { %p2795_p3 = pnand %p2794_p2, %p2788_p13 }
  0x5e   :  { %2798 = shalt.err (!%p2795_p3)
}
  0x5f   :  { %138 = dma.hbm_to_vmem [thread:$0]  %s3687_s13, 16, %s136_s6, [#allocation15]  }
  0x60   :  { %s2799_s24 = scalar_lea.hbm %s3690_s16, 4096 }
  0x61   :  { %p2800_p4 = scmp.ne.s32.totalorder %s3690_s16, %s2799_s24  ;;  %p2803_p5 = scmp.lt.u32.totalorder %s2799_s24, %s3690_s16 }
  0x63   :  { %p2805_p6 = pnand %p2803_p5, %p2800_p4 }
  0x65   :  { %2808 = shalt.err (!%p2805_p6)
}
  0x66   :  { %s2809_s21 = scalar_lea.vmem %s159_s4, 4096  ;;  %p2814_p8 = scmp.lt.s32.totalorder %s159_s4, %s159_s4 }
  0x67   :  { %p2810_p7 = scmp.ne.s32.totalorder %s159_s4, %s2809_s21  ;;  %p2815_p9 = scmp.lt.s32.totalorder %s2809_s21, %s2809_s21 }
  0x69   :  { %p2816_p10 = por %p2815_p9, %p2814_p8 }
  0x6b   :  { %p2817_p11 = pnand %p2816_p10, %p2810_p7 }
  0x6d   :  { %2820 = shalt.err (!%p2817_p11)
}
  0x6e   :  { %164 = dma.hbm_to_vmem [thread:$0]  %s3690_s16, 4096, %s159_s4, [#allocation18], %s3036_s25, %s3036_s25, %s3037_s26  }
  0x6f   :  { %s3042_s27 = smov [#allocation20]   ;;  %s3043_s30 = smov [#allocation2]  }
  0x70   :  { %s181_s3 = sshll.u32 %s3042_s27, 4  ;;  %s41_s8 = sshll.u32 %s3043_s30, 4  ;;  %s182_s3 = int_to_ptr.vmem [resolvable:$true] %s181_s3  ;;  %s42_s8 = int_to_ptr.vmem [resolvable:$true] %s41_s8 }
  0x71   :  { %s2821_s1 = scalar_lea.hbm %s3692_s18, 16 }
  0x72   :  { %p2822_p12 = scmp.ne.s32.totalorder %s3692_s18, %s2821_s1  ;;  %p2825_p13 = scmp.lt.u32.totalorder %s2821_s1, %s3692_s18 }
  0x74   :  { %p2827_p0 = pnand %p2825_p13, %p2822_p12 }
  0x76   :  { %2830 = shalt.err (!%p2827_p0)
}
  0x77   :  { %s2831_s16 = scalar_lea.vmem %s182_s3, 16  ;;  %s2835_s4 = scalar_lea.vmem %s182_s3, 32 }
  0x78   :  { %p2832_p1 = scmp.ne.s32.totalorder %s182_s3, %s2831_s16  ;;  %p2836_p2 = scmp.lt.s32.totalorder %s182_s3, %s182_s3 }
  0x79   :  { %p2837_p3 = scmp.lt.s32.totalorder %s2835_s4, %s2831_s16 }
  0x7b   :  { %p2838_p4 = por %p2837_p3, %p2836_p2 }
  0x7d   :  { %p2839_p5 = pnand %p2838_p4, %p2832_p1 }
  0x7f   :  { %2842 = shalt.err (!%p2839_p5)
}
  0x80   :  { %184 = dma.hbm_to_vmem [thread:$0]  %s3692_s18, 16, %s182_s3, [#allocation21]  }
  0x81   :  { %s3716_s13 = sld [smem:[#allocation32_spill]] }
  0x87   :  { %s2843_s6 = scalar_lea.hbm %s3716_s13, 64 }
  0x88   :  { %p2844_p6 = scmp.ne.s32.totalorder %s3716_s13, %s2843_s6  ;;  %p2847_p7 = scmp.lt.u32.totalorder %s2843_s6, %s3716_s13 }
  0x8a   :  { %p2849_p8 = pnand %p2847_p7, %p2844_p6 }
  0x8c   :  { %2852 = shalt.err (!%p2849_p8)
}
  0x8d   :  { %s2853_s1 = scalar_lea.vmem %s42_s8, 64  ;;  %p2858_p10 = scmp.lt.s32.totalorder %s42_s8, %s42_s8 }
  0x8e   :  { %p2854_p9 = scmp.ne.s32.totalorder %s42_s8, %s2853_s1  ;;  %p2859_p11 = scmp.lt.s32.totalorder %s2853_s1, %s2853_s1 }
  0x90   :  { %p2860_p12 = por %p2859_p11, %p2858_p10 }
  0x92   :  { %p2861_p13 = pnand %p2860_p12, %p2854_p9 }
  0x94   :  { %2864 = shalt.err (!%p2861_p13)
}
  0x95   :  { %44 = dma.hbm_to_vmem [thread:$0]  %s3716_s13, 64, %s42_s8, [#allocation3]  }
  0x96   :  { %s3044_s29 = smov [#allocation7]   ;;  %s3717_s16 = sld [smem:[#allocation34_spill]] }
  0x97   :  { %s62_s5 = sshll.u32 %s3044_s29, 4  ;;  %s63_s5 = int_to_ptr.vmem [resolvable:$true] %s62_s5 }
  0x9c   :  { %s2865_s4 = scalar_lea.hbm %s3717_s16, 512 }
  0x9d   :  { %p2866_p0 = scmp.ne.s32.totalorder %s3717_s16, %s2865_s4  ;;  %p2869_p1 = scmp.lt.u32.totalorder %s2865_s4, %s3717_s16 }
  0x9f   :  { %p2871_p2 = pnand %p2869_p1, %p2866_p0 }
  0xa1   :  { %2874 = shalt.err (!%p2871_p2)
}
  0xa2   :  { %s2875_s6 = scalar_lea.vmem %s63_s5, 512  ;;  %p2880_p4 = scmp.lt.s32.totalorder %s63_s5, %s63_s5 }
  0xa3   :  { %p2876_p3 = scmp.ne.s32.totalorder %s63_s5, %s2875_s6  ;;  %p2881_p5 = scmp.lt.s32.totalorder %s2875_s6, %s2875_s6 }
  0xa5   :  { %p2882_p6 = por %p2881_p5, %p2880_p4 }
  0xa7   :  { %p2883_p7 = pnand %p2882_p6, %p2876_p3 }
  0xa9   :  { %2886 = shalt.err (!%p2883_p7)
}
  0xaa   :  { %s3045_s8 = smov 128   ;;  %s3046_s13 = smov 8  }
  0xab   :  { %68 = dma.hbm_to_vmem [thread:$0]  %s3717_s16, 512, %s63_s5, [#allocation6], %s3045_s8, %s3045_s8, %s3046_s13  }
  0xac   :  { %s3047_s0 = smov [#allocation10]   ;;  %s3048_s1 = smov [#allocation13]  }
  0xad   :  { %s90_s23 = sshll.u32 %s3047_s0, 4  ;;  %s118_s18 = sshll.u32 %s3048_s1, 4  ;;  %s91_s23 = int_to_ptr.vmem [resolvable:$true] %s90_s23  ;;  %s3281_s18 = int_to_ptr.vmem [resolvable:$true] %s118_s18 }
  0xae   :  { %s3718_s24 = sld [smem:[#allocation38_spill]] }
  0xb4   :  { %s2887_s28 = scalar_lea.hbm %s3718_s24, 1024 }
  0xb5   :  { %p2888_p8 = scmp.ne.s32.totalorder %s3718_s24, %s2887_s28  ;;  %p2891_p9 = scmp.lt.u32.totalorder %s2887_s28, %s3718_s24 }
  0xb7   :  { %p2893_p10 = pnand %p2891_p9, %p2888_p8 }
  0xb9   :  { %2896 = shalt.err (!%p2893_p10)
}
  0xba   :  { %s2897_s5 = scalar_lea.vmem %s91_s23, 1024  ;;  %p2902_p12 = scmp.lt.s32.totalorder %s91_s23, %s91_s23 }
  0xbb   :  { %p2898_p11 = scmp.ne.s32.totalorder %s91_s23, %s2897_s5  ;;  %p2903_p13 = scmp.lt.s32.totalorder %s2897_s5, %s2897_s5 }
  0xbd   :  { %p2904_p0 = por %p2903_p13, %p2902_p12 }
  0xbf   :  { %p2905_p1 = pnand %p2904_p0, %p2898_p11 }
  0xc1   :  { %2908 = shalt.err (!%p2905_p1)
}
  0xc2   :  { %96 = dma.hbm_to_vmem [thread:$0]  %s3718_s24, 1024, %s91_s23, [#allocation9], %s3036_s25, %s3036_s25, %s3037_s26  }
  0xc3   :  { %s2909_s13 = scalar_lea.hbm %s3684_s10, 1024 }
  0xc4   :  { %p2910_p2 = scmp.ne.s32.totalorder %s3684_s10, %s2909_s13  ;;  %p2913_p3 = scmp.lt.u32.totalorder %s2909_s13, %s3684_s10 }
  0xc6   :  { %p2915_p4 = pnand %p2913_p3, %p2910_p2 }
  0xc8   :  { %2918 = shalt.err (!%p2915_p4)
}
  0xc9   :  { %s2919_s3 = scalar_lea.vmem %s3281_s18, 1024  ;;  %p2924_p6 = scmp.lt.s32.totalorder %s3281_s18, %s3281_s18 }
  0xca   :  { %p2920_p5 = scmp.ne.s32.totalorder %s3281_s18, %s2919_s3  ;;  %p2925_p7 = scmp.lt.s32.totalorder %s2919_s3, %s2919_s3 }
  0xcc   :  { %p2926_p8 = por %p2925_p7, %p2924_p6 }
  0xce   :  { %p2927_p9 = pnand %p2926_p8, %p2920_p5 }
  0xd0   :  { %2930 = shalt.err (!%p2927_p9)
}
  0xd1   :  { %124 = dma.hbm_to_vmem [thread:$0]  %s3684_s10, 1024, %s3281_s18, [#allocation12], %s3036_s25, %s3036_s25, %s3037_s26  }
  0xd2   :  { %s3049_s24 = smov [#allocation16]   ;;  %s2931_s22 = scalar_lea.hbm %s3688_s14, 4096 }
  0xd3   :  { %s144_s28 = sshll.u32 %s3049_s24, 4  ;;  %p2932_p10 = scmp.ne.s32.totalorder %s3688_s14, %s2931_s22  ;;  %s145_s28 = int_to_ptr.vmem [resolvable:$true] %s144_s28 }
  0xd4   :  { %p2935_p11 = scmp.lt.u32.totalorder %s2931_s22, %s3688_s14 }
  0xd6   :  { %p2937_p12 = pnand %p2935_p11, %p2932_p10 }
  0xd8   :  { %2940 = shalt.err (!%p2937_p12)
}
  0xd9   :  { %s2941_s6 = scalar_lea.vmem %s145_s28, 4096  ;;  %p2946_p0 = scmp.lt.s32.totalorder %s145_s28, %s145_s28 }
  0xda   :  { %p2942_p13 = scmp.ne.s32.totalorder %s145_s28, %s2941_s6  ;;  %p2947_p1 = scmp.lt.s32.totalorder %s2941_s6, %s2941_s6 }
  0xdc   :  { %p2948_p2 = por %p2947_p1, %p2946_p0 }
  0xde   :  { %p2949_p3 = pnand %p2948_p2, %p2942_p13 }
  0xe0   :  { %2952 = shalt.err (!%p2949_p3)
}
  0xe1   :  { %s3050_s10 = smov 256   ;;  %s3051_s25 = smov 16  }
  0xe2   :  { %150 = dma.hbm_to_vmem [thread:$0]  %s3688_s14, 4096, %s145_s28, [#allocation15], %s3050_s10, %s3050_s10, %s3051_s25  }
  0xe3   :  { %s3052_s8 = smov [#allocation19]   ;;  %s3053_s27 = smov [#allocation22]  }
  0xe4   :  { %s171_s13 = sshll.u32 %s3052_s8, 4  ;;  %s191_s30 = sshll.u32 %s3053_s27, 4  ;;  %s172_s13 = int_to_ptr.vmem [resolvable:$true] %s171_s13  ;;  %s192_s30 = int_to_ptr.vmem [resolvable:$true] %s191_s30 }
  0xe5   :  { %s2953_s3 = scalar_lea.hbm %s3691_s17, 16 }
  0xe6   :  { %p2954_p4 = scmp.ne.s32.totalorder %s3691_s17, %s2953_s3  ;;  %p2957_p5 = scmp.lt.u32.totalorder %s2953_s3, %s3691_s17 }
  0xe8   :  { %p2959_p6 = pnand %p2957_p5, %p2954_p4 }
  0xea   :  { %2962 = shalt.err (!%p2959_p6)
}
  0xeb   :  { %s2963_s14 = scalar_lea.vmem %s172_s13, 16  ;;  %s2967_s28 = scalar_lea.vmem %s172_s13, 32 }
  0xec   :  { %p2964_p7 = scmp.ne.s32.totalorder %s172_s13, %s2963_s14  ;;  %p2968_p8 = scmp.lt.s32.totalorder %s172_s13, %s172_s13 }
  0xed   :  { %p2969_p9 = scmp.lt.s32.totalorder %s2967_s28, %s2963_s14 }
  0xef   :  { %p2970_p10 = por %p2969_p9, %p2968_p8 }
  0xf1   :  { %p2971_p11 = pnand %p2970_p10, %p2964_p7 }
  0xf3   :  { %2974 = shalt.err (!%p2971_p11)
}
  0xf4   :  { %174 = dma.hbm_to_vmem [thread:$0]  %s3691_s17, 16, %s172_s13, [#allocation18]  }
  0xf5   :  { %s2975_s16 = scalar_lea.hbm %s3693_s19, 16 }
  0xf6   :  { %p2976_p12 = scmp.ne.s32.totalorder %s3693_s19, %s2975_s16  ;;  %p2979_p13 = scmp.lt.u32.totalorder %s2975_s16, %s3693_s19 }
  0xf8   :  { %p2981_p0 = pnand %p2979_p13, %p2976_p12 }
  0xfa   :  { %2984 = shalt.err (!%p2981_p0)
}
  0xfb   :  { %s2985_s26 = scalar_lea.vmem %s192_s30, 16  ;;  %s2989_s18 = scalar_lea.vmem %s192_s30, 32 }
  0xfc   :  { %p2986_p1 = scmp.ne.s32.totalorder %s192_s30, %s2985_s26  ;;  %p2990_p2 = scmp.lt.s32.totalorder %s192_s30, %s192_s30 }
  0xfd   :  { %p2991_p3 = scmp.lt.s32.totalorder %s2989_s18, %s2985_s26 }
  0xff   :  { %p2992_p4 = por %p2991_p3, %p2990_p2 }
 0x101   :  { %p2993_p5 = pnand %p2992_p4, %p2986_p1 }
 0x103   :  { %2996 = shalt.err (!%p2993_p5)
}
 0x104   :  { %194 = dma.hbm_to_vmem [thread:$0]  %s3693_s19, 16, %s192_s30, [#allocation21]  }
 0x105   :  { %3019 = dma.done.wait [#allocation3], 64  }
 0x106   :  { %3020 = vsyncadd [#allocation3], 4294967232 }
 0x107   :  { %3021 = dma.done.wait [#allocation6], 768  }
 0x108   :  { %3022 = vsyncadd [#allocation6], 4294966528 }
 0x109   :  { %3023 = dma.done.wait [#allocation9], 2048  }
 0x10a   :  { %3024 = vsyncadd [#allocation9], 4294965248 }
 0x10b   :  { %3025 = dma.done.wait [#allocation12], 2048  }
 0x10c   :  { %3026 = vsyncadd [#allocation12], 4294965248 }
 0x10d   :  { %3027 = dma.done.wait [#allocation15], 4112  }
 0x10e   :  { %3028 = vsyncadd [#allocation15], 4294963184 }
 0x10f   :  { %3029 = dma.done.wait [#allocation18], 4112  }
 0x110   :  { %3030 = vsyncadd [#allocation18], 4294963184 }
 0x111   :  { %3031 = dma.done.wait [#allocation21], 32  }
 0x112   :  { %3032 = vsyncadd [#allocation21], 4294967264  ;;  %v2527_v0 = vld [vmem:[#allocation10] sm:$0xff]   ;;  %v2529_v2 = vld [vmem:[#allocation10 + $0x8] sm:$0xff]   ;;  %v3054_v32 = vmov 0.0   ;;  %vm3055_vm0 = vmmov 0   ;;  %v626_v63 = vlaneseq }
 0x113   :  { %v2528_v1 = vld [vmem:[#allocation8] sm:$0xff]   ;;  %2392 = vmatprep.subr.bf16.mxu1 %v2527_v0  ;;  %v2530_v3 = vld [vmem:[#allocation8 + $0x8] sm:$0xff]   ;;  %v2531_v4 = vld [vmem:[#allocation10 + $0x10] sm:$0xff]   ;;  %s3719_s0 = sld [smem:[#allocation37_spill]]  ;;  %s3720_s3 = sld [smem:[#allocation35_spill]]  ;;  %vm671_vm1 = vcmask 130048  }
 0x114   :  { %2393 = vmatpush3.bf16.msra.mxu1 %v2527_v0  ;;  %2372 = vmatprep.subr.bf16.mxu0 %v2528_v1  ;;  %v2532_v5 = vld [vmem:[#allocation8 + $0x10] sm:$0xff]   ;;  %v2533_v6 = vld [vmem:[#allocation10 + $0x18] sm:$0xff]   ;;  %v2535_v8 = vld [vmem:[#allocation10 + $0x20] sm:$0xff]   ;;  %vm1952_vm2 = vcmask 261120   ;;  %s3721_s2 = sld [smem:[#allocation39_spill]] }
 0x115   :  { %2394 = vmatprep.subr.bf16.mxu1 %v2529_v2  ;;  %2373 = vmatpush3.bf16.msra.mxu0 %v2528_v1  ;;  %v2534_v7 = vld [vmem:[#allocation8 + $0x18] sm:$0xff]   ;;  %v2536_v9 = vld [vmem:[#allocation8 + $0x20] sm:$0xff]   ;;  %v2248_v10 = vld [vmem:[#allocation5] sm:$0xff]  }
 0x116   :  { %2374 = vmatprep.subr.bf16.mxu0 %v2530_v3  ;;  %v247_v11 = vld [vmem:[#allocation7] sm:$0xff]  ;;  %v248_v12 = vld [vmem:[#allocation7 + $0x8] sm:$0xff]  ;;  %v2249_v14 = vunpack.c.l.bf16 %v2248_v10  ;;  %v2250_v15 = vunpack.c.h.bf16 %v2248_v10  ;;  %v2255_v17 = vld [vmem:[#allocation5 + $0x8] sm:$0xff]  }
 0x117   :  { %v2537_v13 = vld [vmem:[#allocation10 + $0x28] sm:$0xff]   ;;  %v2539_v18 = vld [vmem:[#allocation10 + $0x30] sm:$0xff]   ;;  %v250_v24 = vld [vmem:[#allocation7 + $0x18] sm:$0xff]  ;;  %v2253_v26 = vunpack.c.l.bf16 %v2255_v17  ;;  %v2254_v27 = vunpack.c.h.bf16 %v2255_v17 }
 0x118   :  { %2395 = vmatpush3.bf16.msra.mxu1 %v2529_v2  ;;  %v2538_v16 = vld [vmem:[#allocation8 + $0x28] sm:$0xff]   ;;  %v3354_v19 = vadd.f32 %v2249_v14, %v247_v11  ;;  %v3356_v20 = vadd.f32 %v2250_v15, %v248_v12  ;;  %v2540_v21 = vld [vmem:[#allocation8 + $0x30] sm:$0xff]   ;;  %v2541_v25 = vld [vmem:[#allocation10 + $0x38] sm:$0xff]   ;;  %v3393_v2 = vshrl.u32 %v626_v63, 7 }
 0x119   :  { %2396 = vmatprep.subr.bf16.mxu1 %v2531_v4  ;;  %2375 = vmatpush3.bf16.msra.mxu0 %v2530_v3  ;;  %v249_v23 = vld [vmem:[#allocation7 + $0x10] sm:$0xff]  ;;  %v2542_v28 = vld [vmem:[#allocation8 + $0x38] sm:$0xff]   ;;  %v3362_v30 = vadd.f32 %v2254_v27, %v250_v24  ;;  %v2139_v33 = vld [vmem:[%s3681_s7] ss:$0 sm:$0xff]  ;;  %s3057_s7 = smov [#allocation23]  }
 0x11a   :  { %2376 = vmatprep.subr.bf16.mxu0 %v2532_v5  ;;  %v255_v22 = vpack.c.bf16 %v3356_v20, %v3354_v19  ;;  %v3360_v29 = vadd.f32 %v2253_v26, %v249_v23  ;;  %v2130_v34 = vld [vmem:[%s3719_s0] ss:$0 sm:$0xff]  ;;  %v2543_v55 = vld [vmem:[#allocation11] sm:$0xff]   ;;  %v2545_v57 = vld [vmem:[#allocation11 + $0x10] sm:$0xff]   ;;  %s3722_s0 = sld [smem:[#allocation40_spill]]  ;;  %s2115_s1 = sshll.u32 %s3057_s7, 4  ;;  %s2116_s1 = int_to_ptr.vmem [resolvable:$true] %s2115_s1 }
 0x11b   :  { %v2544_v56 = vld [vmem:[#allocation11 + $0x8] sm:$0xff]   ;;  %v2546_v58 = vld [vmem:[#allocation11 + $0x18] sm:$0xff]   ;;  %v2547_v59 = vld [vmem:[#allocation11 + $0x20] sm:$0xff]   ;;  %p3002_p7 = scmp.lt.s32.totalorder %s2116_s1, %s2116_s1 }
 0x11c   :  { %2397 = vmatpush3.bf16.msra.mxu1 %v2531_v4  ;;  %2408 = vmatprep.mubr.bf16.mxu1 %v255_v22  ;;  %v256_v31 = vpack.c.bf16 %v3362_v30, %v3360_v29  ;;  %v2548_v60 = vld [vmem:[#allocation11 + $0x28] sm:$0xff]   ;;  %v2549_v61 = vld [vmem:[#allocation11 + $0x30] sm:$0xff]   ;;  %v2550_v62 = vld [vmem:[#allocation11 + $0x38] sm:$0xff]   ;;  %v628_v4 = vsub.s32 0, %v3393_v2 }
 0x11d   :  { %2398 = vmatprep.subr.bf16.mxu1 %v2533_v6  ;;  %2377 = vmatpush3.bf16.msra.mxu0 %v2532_v5  ;;  %v623_v0 = vld [vmem:[%s3720_s3] sm:$0x3]  ;;  %s2997_s3 = scalar_lea.vmem %s2116_s1, 128 }
 0x11e   :  { %2378 = vmatprep.subr.bf16.mxu0 %v2534_v7  ;;  %2388 = vmatprep.mubr.bf16.mxu0 %v255_v22  ;;  %v624_v1 = vsub.f32 1.0, %v623_v0  ;;  %p2998_p6 = scmp.ne.s32.totalorder %s2116_s1, %s2997_s3  ;;  %p3003_p8 = scmp.lt.s32.totalorder %s2997_s3, %s2997_s3 }
 0x120   :  { %2399 = vmatpush3.bf16.msra.mxu1 %v2533_v6  ;;  %v3395_v3 = vmul.f32 -1e+09, %v624_v1  ;;  %p3004_p9 = por %p3003_p8, %p3002_p7 }
 0x121   :  { %2400 = vmatprep.subr.bf16.mxu1 %v2535_v8  ;;  %2379 = vmatpush3.bf16.msra.mxu0 %v2534_v7 }
 0x122   :  { %2380 = vmatprep.subr.bf16.mxu0 %v2536_v9  ;;  %v629_v5 = vrot.slane %v3395_v3, %v628_v4  ;;  %p3005_p10 = pnand %p3004_p9, %p2998_p6 }
 0x124   :  { %2401 = vmatpush3.bf16.msra.mxu1 %v2535_v8 }
 0x125   :  { %2402 = vmatprep.subr.bf16.mxu1 %v2537_v13  ;;  %2381 = vmatpush3.bf16.msra.mxu0 %v2536_v9 }
 0x126   :  { %2382 = vmatprep.subr.bf16.mxu0 %v2538_v16 }
 0x128   :  { %2403 = vmatpush3.bf16.msra.mxu1 %v2537_v13 }
 0x129   :  { %2404 = vmatprep.subr.bf16.mxu1 %v2539_v18  ;;  %2383 = vmatpush3.bf16.msra.mxu0 %v2538_v16 }
 0x12a   :  { %2384 = vmatprep.subr.bf16.mxu0 %v2540_v21 }
 0x12c   :  { %2405 = vmatpush3.bf16.msra.mxu1 %v2539_v18 }
 0x12d   :  { %2406 = vmatprep.subr.bf16.mxu1 %v2541_v25  ;;  %2385 = vmatpush3.bf16.msra.mxu0 %v2540_v21 }
 0x12e   :  { %2386 = vmatprep.subr.bf16.mxu0 %v2542_v28 }
 0x130   :  { %2407 = vmatpush3.bf16.msra.mxu1 %v2541_v25 }
 0x131   :  { %2387 = vmatpush3.bf16.msra.mxu0 %v2542_v28  ;;  %2432 = vmatprep.subr.bf16.mxu1 %v3054_v32 }
 0x132   :  { %2412 = vmatprep.subr.bf16.mxu0 %v2543_v55 }
 0x133   :  { %2409 = vmatmul.mubr.bf16.vlgmr.msra.gmra.mrb[0].mxu1 %v256_v31 }
 0x134   :  { %2389 = vmatmul.mubr.bf16.vlgmr.msra.gmra.mrb[0].mxu0 %v256_v31  ;;  %2434 = vmatprep.mubr.msk.bf16.mxu1 %vm3055_vm0, %v3054_v32 }
 0x135   :  { %2428 = vmatprep.mubr.bf16.mxu0 %v255_v22  ;;  %2413 = vmatpush3.bf16.msra.mxu0 %v2543_v55  ;;  %v741_v55 = vsub.s32 1, %v3393_v2 }
 0x136   :  { %2414 = vmatprep.subr.bf16.mxu0 %v2544_v56 }
 0x139   :  { %2415 = vmatpush3.bf16.msra.mxu0 %v2544_v56 }
 0x13a   :  { %2416 = vmatprep.subr.bf16.mxu0 %v2545_v57 }
 0x13d   :  { %2417 = vmatpush3.bf16.msra.mxu0 %v2545_v57 }
 0x13e   :  { %2418 = vmatprep.subr.bf16.mxu0 %v2546_v58 }
 0x141   :  { %2419 = vmatpush3.bf16.msra.mxu0 %v2546_v58 }
 0x142   :  { %2420 = vmatprep.subr.bf16.mxu0 %v2547_v59 }
 0x145   :  { %2421 = vmatpush3.bf16.msra.mxu0 %v2547_v59 }
 0x146   :  { %2422 = vmatprep.subr.bf16.mxu0 %v2548_v60 }
 0x149   :  { %2423 = vmatpush3.bf16.msra.mxu0 %v2548_v60 }
 0x14a   :  { %2424 = vmatprep.subr.bf16.mxu0 %v2549_v61 }
 0x14d   :  { %2425 = vmatpush3.bf16.msra.mxu0 %v2549_v61 }
 0x14e   :  { %2426 = vmatprep.subr.bf16.mxu0 %v2550_v62 }
 0x151   :  { %2427 = vmatpush3.bf16.msra.mxu0 %v2550_v62 }
 0x154   :  { %2429 = vmatmul.mubr.bf16.vlgmr.msra.gmra.mrb[4].mxu0 %v256_v31  ;;  %v2148_v31 = vld [vmem:[%s3683_s9] ss:$0 sm:$0xff] }
 0x206   :  { %v2410_v35 = vpop.f32.mrb[0].mxu1 }
 0x207   :  { %v3375_v36 = vadd.f32 %v2410_v35, %v2139_v33  ;;  %v482_v37 = vpop.f32.mrb[1].mxu1  ;;  %v2390_v38 = vpop.f32.mrb[0].mxu0 }
 0x208   :  { %v2411_v39 = vpop.f32.mrb[2].mxu1  ;;  %v3377_v40 = vadd.f32 %v2390_v38, %v2130_v34  ;;  %v362_v41 = vpop.f32.mrb[1].mxu0  ;;  %v483_v46 = vadd.f32 %v2139_v33, %v482_v37 }
 0x209   :  { %v3379_v42 = vadd.f32 %v2411_v39, %v2139_v33  ;;  %v485_v43 = vpop.f32.mrb[3].mxu1  ;;  %v363_v44 = vadd.f32 %v2130_v34, %v362_v41  ;;  %v2391_v45 = vpop.f32.mrb[2].mxu0 }
 0x20a   :  { %v486_v47 = vadd.f32 %v2139_v33, %v485_v43  ;;  %v3381_v48 = vadd.f32 %v2391_v45, %v2130_v34  ;;  %v365_v49 = vpop.f32.mrb[3].mxu0 }
 0x20b   :  { %v620_v50 = vpack.c.bf16 %v3379_v42, %v3375_v36  ;;  %v366_v51 = vadd.f32 %v2130_v34, %v365_v49 }
 0x20c   :  { %v619_v52 = vpack.c.bf16 %v486_v47, %v483_v46  ;;  %v618_v53 = vpack.c.bf16 %v3381_v48, %v3377_v40 }
 0x20d   :  { %v617_v54 = vpack.c.bf16 %v366_v51, %v363_v44 }
 0x20e   :  { %2433 = vmatpush3.bf16.xpose.msra.mxu1 %v619_v52 }
 0x20f   :  { %2438 = vmatprep.subr.bf16.mxu1 %v3054_v32 }
 0x215   :  { %2435 = vmatmul.mubr.bf16.vlgmr.msra.gmra.mrb[4].mxu1 %v617_v54 }
 0x216   :  { %2440 = vmatprep.mubr.msk.bf16.mxu1 %vm3055_vm0, %v3054_v32 }
 0x227   :  { %v2430_v26 = vpop.f32.mrb[4].mxu0 }
 0x228   :  { %v602_v27 = vpop.f32.mrb[5].mxu0  ;;  %v611_v34 = vadd.f32 %v2430_v26, %v2148_v31  ;;  %v2558_v26 = vld [vmem:[#allocation13 + $0x38] sm:$0xff]  }
 0x229   :  { %v2431_v28 = vpop.f32.mrb[6].mxu0  ;;  %v603_v35 = vadd.f32 %v2148_v31, %v602_v27 }
 0x22a   :  { %v605_v33 = vpop.f32.mrb[7].mxu0  ;;  %v614_v37 = vadd.f32 %v2431_v28, %v2148_v31 }
 0x22b   :  { %v606_v38 = vadd.f32 %v2148_v31, %v605_v33 }
 0x22c   :  { %v622_v39 = vpack.c.bf16 %v614_v37, %v611_v34 }
 0x22d   :  { %v621_v41 = vpack.c.bf16 %v606_v38, %v603_v35  ;;  %v2159_v35 = vld [vmem:[%s3685_s11] ss:$0 sm:$0xff] }
 0x22f   :  { %2439 = vmatpush3.bf16.msra.mxu1 %v621_v41 }
 0x230   :  { %2444 = vmatprep.subr.bf16.mxu1 %v3054_v32 }
 0x2e8   :  { %v664_v6 = vpop.f32.mrb[4].mxu1 }
 0x2e9   :  { %v665_v7 = vadd.f32 %v664_v6, %v629_v5  ;;  %v2436_v8 = vpop.f32.mrb[5].mxu1 }
 0x2ea   :  { %v667_v9 = vpop.f32.mrb[6].mxu1 }
 0x2eb   :  { %v668_v10 = vadd.f32 %v667_v9, %v629_v5  ;;  %v2437_v11 = vpop.f32.mrb[7].mxu1  ;;  %v672_v12 = vsel %vm671_vm1, %v665_v7, -inf }
 0x2ec   :  { %673 = vmax.xlane.f32.xlu0 %v672_v12  ;;  %v2552_v11 = vld [vmem:[#allocation13 + $0x8] sm:$0xff]   ;;  %v2553_v12 = vld [vmem:[#allocation13 + $0x10] sm:$0xff]  }
 0x2ed   :  { %v675_v13 = vsel %vm671_vm1, %v668_v10, -inf }
 0x2f0   :  { %676 = vmax.xlane.f32.xlu0 %v675_v13  ;;  %v2554_v13 = vld [vmem:[#allocation13 + $0x18] sm:$0xff]  }
 0x379   :  { %v674_v14 = vpop.xlane.xlu0 %673 }
 0x37a   :  { %v678_v15 = vsub.f32 %v665_v7, %v674_v14  ;;  %v2555_v14 = vld [vmem:[#allocation13 + $0x20] sm:$0xff]  }
 0x37c   :  { %v680_v16 = vmul.f32 1.442695, %v678_v15  ;;  %v2556_v15 = vld [vmem:[#allocation13 + $0x28] sm:$0xff]  }
 0x37d   :  { %v677_v17 = vpop.xlane.xlu0 %676 }
 0x37e   :  { %2647 = vpow2.f32 %v680_v16  ;;  %v679_v18 = vsub.f32 %v668_v10, %v677_v17  ;;  %v2551_v10 = vld [vmem:[#allocation13] sm:$0xff]   ;;  %v2557_v16 = vld [vmem:[#allocation13 + $0x30] sm:$0xff]  }
 0x37f   :  { %2456 = vmatprep.subr.bf16.mxu0 %v2551_v10 }
 0x380   :  { %v682_v21 = vmul.f32 1.442695, %v679_v18  ;;  %2457 = vmatpush3.bf16.msra.mxu0 %v2551_v10  ;;  %v2574_v10 = vld [vmem:[#allocation16 + $0x48] ss:$16 sps:$4 sm:$0xff]  }
 0x381   :  { %2458 = vmatprep.subr.bf16.mxu0 %v2552_v11 }
 0x382   :  { %2649 = vpow2.f32 %v682_v21 }
 0x384   :  { %2459 = vmatpush3.bf16.msra.mxu0 %v2552_v11  ;;  %v2579_v11 = vld [vmem:[#allocation16 + $0x64] ss:$16 sps:$4 sm:$0xff]  }
 0x385   :  { %2460 = vmatprep.subr.bf16.mxu0 %v2553_v12 }
 0x388   :  { %v2648_v22 = vpop.eup %2647  ;;  %2461 = vmatpush3.bf16.msra.mxu0 %v2553_v12  ;;  %v2582_v12 = vld [vmem:[#allocation16 + $0x6c] ss:$16 sps:$4 sm:$0xff]  }
 0x389   :  { %v684_v23 = vsel %vm671_vm1, %v2648_v22, 0.0  ;;  %2462 = vmatprep.subr.bf16.mxu0 %v2554_v13 }
 0x38a   :  { %685 = vadd.xlane.f32.xlu1 %v684_v23 }
 0x38c   :  { %v2650_v24 = vpop.eup %2649  ;;  %2463 = vmatpush3.bf16.msra.mxu0 %v2554_v13  ;;  %v2577_v13 = vld [vmem:[#allocation16 + $0x60] ss:$16 sps:$4 sm:$0xff]  }
 0x38d   :  { %v687_v25 = vsel %vm671_vm1, %v2650_v24, 0.0  ;;  %2464 = vmatprep.subr.bf16.mxu0 %v2555_v14 }
 0x38e   :  { %688 = vadd.xlane.f32.xlu1 %v687_v25 }
 0x390   :  { %2465 = vmatpush3.bf16.msra.mxu0 %v2555_v14  ;;  %v2580_v14 = vld [vmem:[#allocation16 + $0x68] ss:$16 sps:$4 sm:$0xff]  }
 0x391   :  { %2466 = vmatprep.subr.bf16.mxu0 %v2556_v15 }
 0x394   :  { %2467 = vmatpush3.bf16.msra.mxu0 %v2556_v15  ;;  %v2585_v15 = vld [vmem:[#allocation16 + $0x84] ss:$16 sps:$4 sm:$0xff]  }
 0x395   :  { %2468 = vmatprep.subr.bf16.mxu0 %v2557_v16 }
 0x398   :  { %2469 = vmatpush3.bf16.msra.mxu0 %v2557_v16  ;;  %v2588_v16 = vld [vmem:[#allocation16 + $0x8c] ss:$16 sps:$4 sm:$0xff]  }
 0x399   :  { %2470 = vmatprep.subr.bf16.mxu0 %v2558_v26 }
 0x39c   :  { %2471 = vmatpush3.bf16.msra.mxu0 %v2558_v26  ;;  %v2600_v26 = vld [vmem:[#allocation16 + $0xcc] ss:$16 sps:$4 sm:$0xff]  }
 0x417   :  { %v686_v43 = vpop.xlane.xlu1 %685 }
 0x418   :  { %2651 = vrcp.f32 %v686_v43 }
 0x41b   :  { %v689_v44 = vpop.xlane.xlu1 %688 }
 0x41c   :  { %2653 = vrcp.f32 %v689_v44 }
 0x422   :  { %v2652_v45 = vpop.eup %2651 }
 0x423   :  { %v692_v47 = vmul.f32 %v2652_v45, %v2648_v22 }
 0x426   :  { %v2654_v46 = vpop.eup %2653 }
 0x427   :  { %v693_v49 = vmul.f32 %v2654_v46, %v2650_v24 }
 0x429   :  { %v694_v51 = vpack.c.bf16 %v693_v49, %v692_v47 }
 0x42b   :  { %2441 = vmatmul.mubr.msk.bf16.vlgmr.msra.gmra.mrb[8].mxu1 %vm671_vm1, %v694_v51 }
 0x42c   :  { %2445 = vmatpush3.bf16.xpose.msra.mxu1 %v620_v50  ;;  %2446 = vmatprep.mubr.msk.bf16.mxu1 %vm3055_vm0, %v3054_v32  ;;  %v742_v50 = vrot.slane %v3395_v3, %v741_v55 }
 0x42d   :  { %2450 = vmatprep.subr.bf16.mxu1 %v3054_v32 }
 0x433   :  { %2447 = vmatmul.mubr.bf16.vlgmr.msra.gmra.mrb[12].mxu1 %v618_v53 }
 0x434   :  { %2451 = vmatpush3.bf16.msra.mxu1 %v622_v39  ;;  %2452 = vmatprep.mubr.msk.bf16.mxu1 %vm3055_vm0, %v3054_v32 }
 0x4fe   :  { %v732_v52 = vpop.f32.mrb[8].mxu1 }
 0x4ff   :  { %v2442_v54 = vpop.f32.mrb[9].mxu1 }
 0x500   :  { %v735_v56 = vpop.f32.mrb[10].mxu1  ;;  %v2559_v54 = vld [vmem:[#allocation16] ss:$16 sps:$4 sm:$0xff]  }
 0x501   :  { %v851_v36 = vpack.c.bf16 %v735_v56, %v732_v52  ;;  %v2443_v42 = vpop.f32.mrb[11].mxu1  ;;  %v2561_v56 = vld [vmem:[#allocation16 + $0x4] ss:$16 sps:$4 sm:$0xff]  }
 0x502   :  { %v2564_v42 = vld [vmem:[#allocation16 + $0xc] ss:$16 sps:$4 sm:$0xff]   ;;  %1260 = vmatprep.subr.bf16.mxu1 %v2561_v56 }
 0x503   :  { %2472 = vmatprep.mubr.bf16.mxu0 %v851_v36  ;;  %v2562_v36 = vld [vmem:[#allocation16 + $0x8] ss:$16 sps:$4 sm:$0xff]   ;;  %1313 = vmatprep.subr.bf16.mxu0 %v2564_v42 }
 0x506   :  { %v777_v57 = vpop.f32.mrb[12].mxu1 }
 0x507   :  { %v778_v58 = vadd.f32 %v777_v57, %v742_v50  ;;  %v2448_v40 = vpop.f32.mrb[13].mxu1  ;;  %v2570_v57 = vld [vmem:[#allocation16 + $0x2c] ss:$16 sps:$4 sm:$0xff]  }
 0x508   :  { %v780_v48 = vpop.f32.mrb[14].mxu1 }
 0x509   :  { %v781_v53 = vadd.f32 %v780_v48, %v742_v50  ;;  %v2449_v59 = vpop.f32.mrb[15].mxu1  ;;  %v784_v60 = vsel %vm671_vm1, %v778_v58, -inf  ;;  %v2567_v50 = vld [vmem:[#allocation16 + $0x24] ss:$16 sps:$4 sm:$0xff]  }
 0x50a   :  { %785 = vmax.xlane.f32.xlu0 %v784_v60 }
 0x50b   :  { %v787_v61 = vsel %vm671_vm1, %v781_v53, -inf }
 0x50c   :  { %788 = vmax.xlane.f32.xlu1 %v787_v61 }
 0x597   :  { %v786_v62 = vpop.xlane.xlu0 %785 }
 0x598   :  { %v790_v63 = vsub.f32 %v778_v58, %v786_v62 }
 0x599   :  { %v789_v0 = vpop.xlane.xlu1 %788 }
 0x59a   :  { %v792_v1 = vmul.f32 1.442695, %v790_v63  ;;  %v791_v5 = vsub.f32 %v781_v53, %v789_v0 }
 0x59c   :  { %2655 = vpow2.f32 %v792_v1  ;;  %v794_v6 = vmul.f32 1.442695, %v791_v5 }
 0x59e   :  { %2657 = vpow2.f32 %v794_v6 }
 0x5a6   :  { %v2656_v3 = vpop.eup %2655 }
 0x5a7   :  { %v796_v7 = vsel %vm671_vm1, %v2656_v3, 0.0 }
 0x5a8   :  { %v2658_v8 = vpop.eup %2657  ;;  %797 = vadd.xlane.f32.xlu0 %v796_v7  ;;  %v2573_v7 = vld [vmem:[#allocation16 + $0x44] ss:$16 sps:$4 sm:$0xff]  }
 0x5a9   :  { %v799_v9 = vsel %vm671_vm1, %v2658_v8, 0.0 }
 0x5aa   :  { %800 = vadd.xlane.f32.xlu1 %v799_v9  ;;  %v2571_v9 = vld [vmem:[#allocation16 + $0x40] ss:$16 sps:$4 sm:$0xff]  }
 0x635   :  { %v798_v17 = vpop.xlane.xlu0 %797 }
 0x636   :  { %2659 = vrcp.f32 %v798_v17  ;;  %v2583_v17 = vld [vmem:[#allocation16 + $0x80] ss:$16 sps:$4 sm:$0xff]  }
 0x637   :  { %v801_v18 = vpop.xlane.xlu1 %800 }
 0x638   :  { %2661 = vrcp.f32 %v801_v18  ;;  %v2586_v18 = vld [vmem:[#allocation16 + $0x88] ss:$16 sps:$4 sm:$0xff]  }
 0x640   :  { %v2660_v21 = vpop.eup %2659 }
 0x641   :  { %v804_v23 = vmul.f32 %v2660_v21, %v2656_v3  ;;  %v2591_v21 = vld [vmem:[#allocation16 + $0xa4] ss:$16 sps:$4 sm:$0xff]  }
 0x642   :  { %v2662_v22 = vpop.eup %2661 }
 0x643   :  { %v805_v24 = vmul.f32 %v2662_v22, %v2658_v8  ;;  %v2576_v8 = vld [vmem:[#allocation16 + $0x4c] ss:$16 sps:$4 sm:$0xff]  }
 0x644   :  { %v2594_v22 = vld [vmem:[#allocation16 + $0xac] ss:$16 sps:$4 sm:$0xff]  }
 0x645   :  { %v806_v25 = vpack.c.bf16 %v805_v24, %v804_v23  ;;  %v2589_v23 = vld [vmem:[#allocation16 + $0xa0] ss:$16 sps:$4 sm:$0xff]   ;;  %v2592_v24 = vld [vmem:[#allocation16 + $0xa8] ss:$16 sps:$4 sm:$0xff]  }
 0x647   :  { %2453 = vmatmul.mubr.msk.bf16.vlgmr.msra.gmra.mrb[16].mxu1 %vm671_vm1, %v806_v25  ;;  %v2597_v25 = vld [vmem:[#allocation16 + $0xc4] ss:$16 sps:$4 sm:$0xff]  }
 0x648   :  { %1261 = vmatpush1.bf16.msra.mxu1 %v2559_v54 }
 0x649   :  { %1262 = vmatprep.subr.bf16.mxu1 %v2567_v50 }
 0x71a   :  { %v844_v27 = vpop.f32.mrb[16].mxu1 }
 0x71b   :  { %v2454_v28 = vpop.f32.mrb[17].mxu1 }
 0x71c   :  { %v847_v31 = vpop.f32.mrb[18].mxu1  ;;  %v2598_v28 = vld [vmem:[#allocation16 + $0xc8] ss:$16 sps:$4 sm:$0xff]  }
 0x71d   :  { %v852_v33 = vpack.c.bf16 %v847_v31, %v844_v27  ;;  %v2455_v34 = vpop.f32.mrb[19].mxu1  ;;  %v2595_v27 = vld [vmem:[#allocation16 + $0xc0] ss:$16 sps:$4 sm:$0xff]   ;;  %v2603_v31 = vld [vmem:[#allocation16 + $0xe4] ss:$16 sps:$4 sm:$0xff]  }
 0x71e   :  { %v2601_v34 = vld [vmem:[#allocation16 + $0xe0] ss:$16 sps:$4 sm:$0xff]  }
 0x71f   :  { %2473 = vmatmul.mubr.bf16.vlgmr.msra.gmra.mrb[8].mxu0 %v852_v33  ;;  %v2606_v33 = vld [vmem:[#allocation16 + $0xec] ss:$16 sps:$4 sm:$0xff]  }
 0x720   :  { %1314 = vmatpush1.bf16.msra.mxu0 %v2562_v36  ;;  %v2168_v36 = vld [vmem:[%s3686_s12] ss:$0 sm:$0xff] }
 0x721   :  { %1315 = vmatprep.subr.bf16.mxu0 %v2570_v57 }
 0x7f2   :  { %v2474_v37 = vpop.f32.mrb[8].mxu0 }
 0x7f3   :  { %v958_v38 = vpop.f32.mrb[9].mxu0  ;;  %v967_v44 = vadd.f32 %v2474_v37, %v2159_v35  ;;  %v3056_v37 = vmov 0  }
 0x7f4   :  { %v959_v39 = vadd.f32 %v2159_v35, %v958_v38  ;;  %v2475_v41 = vpop.f32.mrb[10].mxu0  ;;  %1292 = vmatprep.mubr.bf16.mxu1 %v3056_v37  ;;  %1345 = vmatprep.mubr.bf16.mxu0 %v3056_v37 }
 0x7f5   :  { %v961_v43 = vpop.f32.mrb[11].mxu0  ;;  %v970_v47 = vadd.f32 %v2475_v41, %v2159_v35  ;;  %v975_v51 = vadd.f32 %v967_v44, %v3360_v29 }
 0x7f6   :  { %v962_v45 = vadd.f32 %v2159_v35, %v961_v43  ;;  %v973_v46 = vadd.f32 %v959_v39, %v3354_v19  ;;  %v2565_v19 = vld [vmem:[#allocation16 + $0x20] ss:$16 sps:$4 sm:$0xff]   ;;  %v2604_v35 = vld [vmem:[#allocation16 + $0xe8] ss:$16 sps:$4 sm:$0xff]  }
 0x7f7   :  { %v976_v52 = vadd.f32 %v970_v47, %v3362_v30  ;;  %1263 = vmatpush1.bf16.msra.mxu1 %v2565_v19 }
 0x7f8   :  { %979 = vadd.xlane.f32.xlu0 %v973_v46  ;;  %v974_v49 = vadd.f32 %v962_v45, %v3356_v20  ;;  %v2568_v20 = vld [vmem:[#allocation16 + $0x28] ss:$16 sps:$4 sm:$0xff]   ;;  %1264 = vmatprep.subr.bf16.mxu1 %v2573_v7  ;;  %v2610_v7 = vld [vmem:[#allocation17 + $0x80] sm:$0xff]  }
 0x7f9   :  { %1316 = vmatpush1.bf16.msra.mxu0 %v2568_v20 }
 0x7fa   :  { %981 = vadd.xlane.f32.xlu1 %v974_v49  ;;  %1317 = vmatprep.subr.bf16.mxu0 %v2576_v8  ;;  %v2611_v8 = vld [vmem:[#allocation17 + $0x48] sm:$0xff]  }
 0x7fb   :  { %1265 = vmatpush1.bf16.msra.mxu1 %v2571_v9  ;;  %v2612_v9 = vld [vmem:[#allocation17 + $0xc8] sm:$0xff]  }
 0x7fc   :  { %983 = vadd.xlane.f32.xlu0 %v975_v51  ;;  %1266 = vmatprep.subr.bf16.mxu1 %v2579_v11  ;;  %v2614_v11 = vld [vmem:[#allocation17 + $0x88] sm:$0xff]  }
 0x7fd   :  { %1318 = vmatpush1.bf16.msra.mxu0 %v2574_v10  ;;  %v2613_v10 = vld [vmem:[#allocation17 + $0x8] sm:$0xff]  }
 0x7fe   :  { %985 = vadd.xlane.f32.xlu1 %v976_v52  ;;  %1319 = vmatprep.subr.bf16.mxu0 %v2582_v12  ;;  %v2615_v12 = vld [vmem:[#allocation17 + $0x50] sm:$0xff]  }
 0x7ff   :  { %1267 = vmatpush1.bf16.msra.mxu1 %v2577_v13  ;;  %v2616_v13 = vld [vmem:[#allocation17 + $0xd0] sm:$0xff]  }
 0x800   :  { %1268 = vmatprep.subr.bf16.mxu1 %v2585_v15  ;;  %v2618_v15 = vld [vmem:[#allocation17 + $0x90] sm:$0xff]  }
 0x801   :  { %1320 = vmatpush1.bf16.msra.mxu0 %v2580_v14  ;;  %v2617_v14 = vld [vmem:[#allocation17 + $0x10] sm:$0xff]  }
 0x802   :  { %1321 = vmatprep.subr.bf16.mxu0 %v2588_v16  ;;  %v2619_v16 = vld [vmem:[#allocation17 + $0x58] sm:$0xff]  }
 0x803   :  { %1269 = vmatpush1.bf16.msra.mxu1 %v2583_v17  ;;  %v2620_v17 = vld [vmem:[#allocation17 + $0xd8] sm:$0xff]  }
 0x804   :  { %1270 = vmatprep.subr.bf16.mxu1 %v2591_v21  ;;  %v2622_v21 = vld [vmem:[#allocation17 + $0x98] sm:$0xff]  }
 0x805   :  { %1322 = vmatpush1.bf16.msra.mxu0 %v2586_v18  ;;  %v2621_v18 = vld [vmem:[#allocation17 + $0x18] sm:$0xff]  }
 0x806   :  { %1323 = vmatprep.subr.bf16.mxu0 %v2594_v22  ;;  %v2623_v22 = vld [vmem:[#allocation17 + $0x60] sm:$0xff]  }
 0x807   :  { %1271 = vmatpush1.bf16.msra.mxu1 %v2589_v23  ;;  %v2624_v23 = vld [vmem:[#allocation17 + $0xe0] sm:$0xff]  }
 0x808   :  { %1272 = vmatprep.subr.bf16.mxu1 %v2597_v25  ;;  %v2626_v25 = vld [vmem:[#allocation17 + $0xa0] sm:$0xff]  }
 0x809   :  { %1324 = vmatpush1.bf16.msra.mxu0 %v2592_v24  ;;  %v2625_v24 = vld [vmem:[#allocation17 + $0x20] sm:$0xff]  }
 0x80a   :  { %1325 = vmatprep.subr.bf16.mxu0 %v2600_v26  ;;  %v2627_v26 = vld [vmem:[#allocation17 + $0x68] sm:$0xff]  }
 0x80b   :  { %1273 = vmatpush1.bf16.msra.mxu1 %v2595_v27  ;;  %v2628_v27 = vld [vmem:[#allocation17 + $0xe8] sm:$0xff]  }
 0x80c   :  { %1274 = vmatprep.subr.bf16.mxu1 %v2603_v31  ;;  %v2630_v31 = vld [vmem:[#allocation17 + $0xa8] sm:$0xff]  }
 0x80d   :  { %1326 = vmatpush1.bf16.msra.mxu0 %v2598_v28  ;;  %v2629_v28 = vld [vmem:[#allocation17 + $0x28] sm:$0xff]  }
 0x80e   :  { %1327 = vmatprep.subr.bf16.mxu0 %v2606_v33  ;;  %v2631_v33 = vld [vmem:[#allocation17 + $0x70] sm:$0xff]  }
 0x80f   :  { %1275 = vmatpush1.bf16.msra.mxu1 %v2601_v34  ;;  %v2632_v34 = vld [vmem:[#allocation17 + $0xf0] sm:$0xff]  }
 0x811   :  { %1328 = vmatpush1.bf16.msra.mxu0 %v2604_v35  ;;  %v2633_v35 = vld [vmem:[#allocation17 + $0x30] sm:$0xff]  }
 0x885   :  { %v980_v29 = vpop.xlane.xlu0 %979 }
 0x886   :  { %v988_v58 = vmul.f32 0.0078125, %v980_v29  ;;  %v2169_v29 = vld [vmem:[#allocation14] ss:$0 sm:$0xff] }
 0x887   :  { %v982_v30 = vpop.xlane.xlu1 %981 }
 0x888   :  { %v3437_v40 = vsub.f32 %v973_v46, %v988_v58  ;;  %v989_v48 = vmul.f32 0.0078125, %v982_v30 }
 0x889   :  { %v984_v53 = vpop.xlane.xlu0 %983 }
 0x88a   :  { %v3439_v59 = vsub.f32 %v974_v49, %v989_v48  ;;  %v990_v60 = vmul.f32 0.0078125, %v984_v53  ;;  %v996_v61 = vmul.f32 %v3437_v40, %v3437_v40 }
 0x88b   :  { %v986_v62 = vpop.xlane.xlu1 %985 }
 0x88c   :  { %v3443_v63 = vsub.f32 %v975_v51, %v990_v60  ;;  %v991_v0 = vmul.f32 0.0078125, %v986_v62  ;;  %1000 = vadd.xlane.f32.xlu0 %v996_v61  ;;  %v997_v1 = vmul.f32 %v3439_v59, %v3439_v59 }
 0x88e   :  { %v3447_v5 = vsub.f32 %v976_v52, %v991_v0  ;;  %1002 = vadd.xlane.f32.xlu1 %v997_v1  ;;  %v998_v6 = vmul.f32 %v3443_v63, %v3443_v63 }
 0x890   :  { %1004 = vadd.xlane.f32.xlu0 %v998_v6  ;;  %v999_v3 = vmul.f32 %v3447_v5, %v3447_v5 }
 0x892   :  { %1006 = vadd.xlane.f32.xlu1 %v999_v3  ;;  %v2609_v3 = vld [vmem:[#allocation17] sm:$0xff]  }
 0x919   :  { %v1001_v38 = vpop.xlane.xlu0 %1000 }
 0x91a   :  { %v1008_v39 = vmul.f32 0.0078125, %v1001_v38  ;;  %v2635_v38 = vld [vmem:[#allocation17 + $0x78] sm:$0xff]  }
 0x91b   :  { %v1003_v41 = vpop.xlane.xlu1 %1002 }
 0x91c   :  { %v1012_v43 = vadd.f32 1e-05, %v1008_v39  ;;  %v1009_v44 = vmul.f32 0.0078125, %v1003_v41  ;;  %v2636_v39 = vld [vmem:[#allocation17 + $0xf8] sm:$0xff]  }
 0x91d   :  { %v1005_v45 = vpop.xlane.xlu0 %1004  ;;  %v2637_v41 = vld [vmem:[#allocation17 + $0x38] sm:$0xff]  }
 0x91e   :  { %2663 = vrsqrt.f32 %v1012_v43  ;;  %v1013_v46 = vadd.f32 1e-05, %v1009_v44  ;;  %v1010_v47 = vmul.f32 0.0078125, %v1005_v45  ;;  %v2638_v43 = vld [vmem:[#allocation17 + $0xb8] sm:$0xff]   ;;  %v1090_v44 = vsub.s32 2, %v3393_v2 }
 0x91f   :  { %v1007_v49 = vpop.xlane.xlu1 %1006  ;;  %v1078_v45 = vld [vmem:[%s3689_s15] sm:$0xf] }
 0x920   :  { %2665 = vrsqrt.f32 %v1013_v46  ;;  %v1014_v51 = vadd.f32 1e-05, %v1010_v47  ;;  %v1011_v52 = vmul.f32 0.0078125, %v1007_v49  ;;  %v1094_v46 = vsub.s32 3, %v3393_v2 }
 0x921   :  { %v3480_v47 = vrot.slane %v1078_v45, %v628_v4  ;;  %v3482_v49 = vrot.slane %v1078_v45, %v1090_v44 }
 0x922   :  { %2667 = vrsqrt.f32 %v1014_v51  ;;  %v1015_v54 = vadd.f32 1e-05, %v1011_v52  ;;  %v3486_v51 = vrot.slane %v1078_v45, %v741_v55  ;;  %v3488_v52 = vrot.slane %v1078_v45, %v1094_v46 }
 0x924   :  { %2669 = vrsqrt.f32 %v1015_v54 }
 0x928   :  { %v2664_v56 = vpop.eup %2663 }
 0x929   :  { %v1020_v42 = vmul.f32 %v2664_v56, %v3437_v40 }
 0x92a   :  { %v2666_v50 = vpop.eup %2665 }
 0x92b   :  { %v1021_v57 = vmul.f32 %v2666_v50, %v3439_v59  ;;  %v1030_v19 = vmul.f32 %v2168_v36, %v1020_v42 }
 0x92c   :  { %v2668_v20 = vpop.eup %2667 }
 0x92d   :  { %v1031_v58 = vmul.f32 %v2168_v36, %v1021_v57  ;;  %v3458_v48 = vadd.f32 %v2169_v29, %v1030_v19  ;;  %v1022_v60 = vmul.f32 %v2668_v20, %v3443_v63  ;;  %v2607_v63 = vld [vmem:[#allocation17 + $0x40] sm:$0xff]  }
 0x92e   :  { %v2670_v30 = vpop.eup %2669  ;;  %2304 = vmatprep.subr.bf16.mxu1 %v2607_v63 }
 0x92f   :  { %v3460_v53 = vadd.f32 %v2169_v29, %v1031_v58  ;;  %v1023_v61 = vmul.f32 %v2670_v30, %v3447_v5  ;;  %v1032_v59 = vmul.f32 %v2168_v36, %v1022_v60  ;;  %v2608_v5 = vld [vmem:[#allocation17 + $0xc0] sm:$0xff]  }
 0x930   :  { %2332 = vmatprep.subr.bf16.mxu0 %v2608_v5 }
 0x931   :  { %v1044_v62 = vpack.c.bf16 %v3460_v53, %v3458_v48  ;;  %v1033_v40 = vmul.f32 %v2168_v36, %v1023_v61  ;;  %v3468_v1 = vadd.f32 %v2169_v29, %v1032_v59 }
 0x933   :  { %1293 = vmatmul.mubr.bf16.vlgmr.msra.gmra.mrb[20].mxu1 %v1044_v62  ;;  %1346 = vmatmul.mubr.bf16.vlgmr.msra.gmra.mrb[12].mxu0 %v1044_v62  ;;  %v3466_v0 = vadd.f32 %v2169_v29, %v1033_v40 }
 0x934   :  { %1302 = vmatprep.mubr.bf16.mxu1 %v3056_v37  ;;  %1355 = vmatprep.mubr.bf16.mxu0 %v3056_v37  ;;  %v2634_v37 = vld [vmem:[#allocation17 + $0xb0] sm:$0xff]  }
 0x935   :  { %v1045_v6 = vpack.c.bf16 %v3466_v0, %v3468_v1  ;;  %2305 = vmatpush3.bf16.msra.mxu1 %v2609_v3  ;;  %2333 = vmatpush3.bf16.msra.mxu0 %v2610_v7 }
 0x936   :  { %2306 = vmatprep.subr.bf16.mxu1 %v2611_v8  ;;  %2334 = vmatprep.subr.bf16.mxu0 %v2612_v9 }
 0x939   :  { %2307 = vmatpush3.bf16.msra.mxu1 %v2613_v10  ;;  %2335 = vmatpush3.bf16.msra.mxu0 %v2614_v11 }
 0x93a   :  { %2308 = vmatprep.subr.bf16.mxu1 %v2615_v12  ;;  %2336 = vmatprep.subr.bf16.mxu0 %v2616_v13 }
 0x93b   :  { %1303 = vmatmul.mubr.bf16.gmra.mrb[24].mxu1 %v1045_v6  ;;  %1356 = vmatmul.mubr.bf16.gmra.mrb[16].mxu0 %v1045_v6 }
 0x93d   :  { %2309 = vmatpush3.bf16.msra.mxu1 %v2617_v14  ;;  %2337 = vmatpush3.bf16.msra.mxu0 %v2618_v15 }
 0x93e   :  { %2310 = vmatprep.subr.bf16.mxu1 %v2619_v16  ;;  %2338 = vmatprep.subr.bf16.mxu0 %v2620_v17 }
 0x941   :  { %2311 = vmatpush3.bf16.msra.mxu1 %v2621_v18  ;;  %2339 = vmatpush3.bf16.msra.mxu0 %v2622_v21 }
 0x942   :  { %2312 = vmatprep.subr.bf16.mxu1 %v2623_v22  ;;  %2340 = vmatprep.subr.bf16.mxu0 %v2624_v23 }
 0x945   :  { %2313 = vmatpush3.bf16.msra.mxu1 %v2625_v24  ;;  %2341 = vmatpush3.bf16.msra.mxu0 %v2626_v25 }
 0x946   :  { %2314 = vmatprep.subr.bf16.mxu1 %v2627_v26  ;;  %2342 = vmatprep.subr.bf16.mxu0 %v2628_v27 }
 0x949   :  { %2315 = vmatpush3.bf16.msra.mxu1 %v2629_v28  ;;  %2343 = vmatpush3.bf16.msra.mxu0 %v2630_v31 }
 0x94a   :  { %2316 = vmatprep.subr.bf16.mxu1 %v2631_v33  ;;  %2344 = vmatprep.subr.bf16.mxu0 %v2632_v34 }
 0x94d   :  { %2317 = vmatpush3.bf16.msra.mxu1 %v2633_v35  ;;  %2345 = vmatpush3.bf16.msra.mxu0 %v2634_v37 }
 0x94e   :  { %2318 = vmatprep.subr.bf16.mxu1 %v2635_v38  ;;  %2346 = vmatprep.subr.bf16.mxu0 %v2636_v39 }
 0x951   :  { %2319 = vmatpush3.bf16.msra.mxu1 %v2637_v41  ;;  %2347 = vmatpush3.bf16.msra.mxu0 %v2638_v43 }
 0x952   :  { %2476 = vmatprep.subr.bf16.mxu1 %v3054_v32 }
 0xa06   :  { %v1294_v54 = vpop.f32.mrb[20].mxu1  ;;  %v1347_v56 = vpop.f32.mrb[12].mxu0 }
 0xa07   :  { %v3491_v36 = vadd.f32 %v1294_v54, %v3480_v47  ;;  %v3494_v42 = vadd.f32 %v1347_v56, %v3482_v49  ;;  %v1296_v50 = vpop.f32.mrb[21].mxu1  ;;  %v1349_v57 = vpop.f32.mrb[13].mxu0 }
 0xa08   :  { %v3497_v4 = vadd.f32 %v1296_v50, %v3486_v51  ;;  %v3500_v19 = vadd.f32 %v1349_v57, %v3488_v52  ;;  %v1298_v2 = vpop.f32.mrb[22].mxu1  ;;  %v1351_v55 = vpop.f32.mrb[14].mxu0 }
 0xa09   :  { %v1366_v20 = vmul.f32 %v3491_v36, %v3491_v36  ;;  %v1368_v29 = vmul.f32 %v3494_v42, %v3494_v42  ;;  %v3507_v58 = vadd.f32 %v1298_v2, %v3480_v47  ;;  %v3510_v30 = vadd.f32 %v1351_v55, %v3482_v49  ;;  %v1300_v60 = vpop.f32.mrb[23].mxu1  ;;  %v1353_v61 = vpop.f32.mrb[15].mxu0 }
 0xa0a   :  { %v1367_v62 = vmul.f32 %v3497_v4, %v3497_v4  ;;  %v1369_v40 = vmul.f32 %v3500_v19, %v3500_v19  ;;  %v3517_v59 = vadd.f32 %v1300_v60, %v3486_v51  ;;  %v3520_v6 = vadd.f32 %v1353_v61, %v3488_v52 }
 0xa0b   :  { %v1382_v63 = vmul.f32 %v1366_v20, %v3491_v36  ;;  %v1384_v5 = vmul.f32 %v1368_v29, %v3494_v42  ;;  %v1370_v3 = vmul.f32 %v3507_v58, %v3507_v58  ;;  %v1372_v7 = vmul.f32 %v3510_v30, %v3510_v30 }
 0xa0c   :  { %v1383_v8 = vmul.f32 %v1367_v62, %v3497_v4  ;;  %v1385_v9 = vmul.f32 %v1369_v40, %v3500_v19  ;;  %v1371_v10 = vmul.f32 %v3517_v59, %v3517_v59  ;;  %v1373_v11 = vmul.f32 %v3520_v6, %v3520_v6 }
 0xa0d   :  { %v1398_v12 = vmul.f32 0.044715, %v1382_v63  ;;  %v1400_v13 = vmul.f32 0.044715, %v1384_v5  ;;  %v1386_v14 = vmul.f32 %v1370_v3, %v3507_v58  ;;  %v1388_v15 = vmul.f32 %v1372_v7, %v3510_v30 }
 0xa0e   :  { %v1399_v16 = vmul.f32 0.044715, %v1383_v8  ;;  %v1401_v17 = vmul.f32 0.044715, %v1385_v9  ;;  %v1387_v18 = vmul.f32 %v1371_v10, %v3517_v59  ;;  %v1389_v21 = vmul.f32 %v1373_v11, %v3520_v6  ;;  %v1304_v22 = vpop.f32.mrb[24].mxu1  ;;  %v1357_v23 = vpop.f32.mrb[16].mxu0 }
 0xa0f   :  { %v1414_v24 = vadd.f32 %v1398_v12, %v3491_v36  ;;  %v1416_v25 = vadd.f32 %v1400_v13, %v3494_v42  ;;  %v1402_v26 = vmul.f32 0.044715, %v1386_v14  ;;  %v1404_v27 = vmul.f32 0.044715, %v1388_v15  ;;  %v1306_v28 = vpop.f32.mrb[25].mxu1  ;;  %v1359_v31 = vpop.f32.mrb[17].mxu0 }
 0xa10   :  { %v1415_v33 = vadd.f32 %v1399_v16, %v3497_v4  ;;  %v1417_v34 = vadd.f32 %v1401_v17, %v3500_v19  ;;  %v1403_v35 = vmul.f32 0.044715, %v1387_v18  ;;  %v1405_v37 = vmul.f32 0.044715, %v1389_v21  ;;  %v1308_v38 = vpop.f32.mrb[26].mxu1  ;;  %v1361_v39 = vpop.f32.mrb[18].mxu0 }
 0xa11   :  { %v1430_v41 = vmul.f32 0.7978846, %v1414_v24  ;;  %v1432_v43 = vmul.f32 0.7978846, %v1416_v25  ;;  %v1418_v44 = vadd.f32 %v1402_v26, %v3507_v58  ;;  %v1420_v45 = vadd.f32 %v1404_v27, %v3510_v30  ;;  %v1310_v46 = vpop.f32.mrb[27].mxu1  ;;  %v1363_v54 = vpop.f32.mrb[19].mxu0 }
 0xa12   :  { %v1431_v56 = vmul.f32 0.7978846, %v1415_v33  ;;  %v1433_v50 = vmul.f32 0.7978846, %v1417_v34  ;;  %v1419_v57 = vadd.f32 %v1403_v35, %v3517_v59  ;;  %v1421_v2 = vadd.f32 %v1405_v37, %v3520_v6 }
 0xa13   :  { %2671 = vtanh.f32 %v1430_v41  ;;  %v1434_v55 = vmul.f32 0.7978846, %v1418_v44  ;;  %v1436_v20 = vmul.f32 0.7978846, %v1420_v45  ;;  %v3547_v29 = vadd.f32 %v1304_v22, %v3480_v47 }
 0xa14   :  { %2673 = vtanh.f32 %v1432_v43  ;;  %v1435_v60 = vmul.f32 0.7978846, %v1419_v57  ;;  %v1437_v61 = vmul.f32 0.7978846, %v1421_v2  ;;  %v3550_v62 = vadd.f32 %v1357_v23, %v3482_v49 }
 0xa15   :  { %2675 = vtanh.f32 %v1431_v56  ;;  %v1374_v40 = vmul.f32 %v3547_v29, %v3547_v29  ;;  %v3555_v63 = vadd.f32 %v1306_v28, %v3486_v51  ;;  %v3558_v5 = vadd.f32 %v1359_v31, %v3488_v52 }
 0xa16   :  { %2677 = vtanh.f32 %v1433_v50  ;;  %v1376_v3 = vmul.f32 %v3550_v62, %v3550_v62  ;;  %v3563_v7 = vadd.f32 %v1308_v38, %v3480_v47  ;;  %v3566_v8 = vadd.f32 %v1361_v39, %v3482_v49 }
 0xa17   :  { %2679 = vtanh.f32 %v1434_v55  ;;  %v1390_v9 = vmul.f32 %v1374_v40, %v3547_v29  ;;  %v1375_v10 = vmul.f32 %v3555_v63, %v3555_v63  ;;  %v1377_v11 = vmul.f32 %v3558_v5, %v3558_v5 }
 0xa18   :  { %2681 = vtanh.f32 %v1436_v20  ;;  %v1392_v12 = vmul.f32 %v1376_v3, %v3550_v62  ;;  %v1378_v13 = vmul.f32 %v3563_v7, %v3563_v7  ;;  %v1380_v47 = vmul.f32 %v3566_v8, %v3566_v8 }
 0xa19   :  { %2683 = vtanh.f32 %v1435_v60  ;;  %v1406_v49 = vmul.f32 0.044715, %v1390_v9  ;;  %v1391_v14 = vmul.f32 %v1375_v10, %v3555_v63  ;;  %v1393_v15 = vmul.f32 %v1377_v11, %v3558_v5 }
 0xa1a   :  { %2685 = vtanh.f32 %v1437_v61  ;;  %v1408_v16 = vmul.f32 0.044715, %v1392_v12  ;;  %v1394_v17 = vmul.f32 %v1378_v13, %v3563_v7  ;;  %v1396_v18 = vmul.f32 %v1380_v47, %v3566_v8 }
 0xa1b   :  { %v1422_v21 = vadd.f32 %v1406_v49, %v3547_v29  ;;  %v1407_v22 = vmul.f32 0.044715, %v1391_v14  ;;  %v1409_v23 = vmul.f32 0.044715, %v1393_v15  ;;  %v3584_v24 = vadd.f32 %v1310_v46, %v3486_v51 }
 0xa1c   :  { %v1424_v25 = vadd.f32 %v1408_v16, %v3550_v62  ;;  %v1410_v26 = vmul.f32 0.044715, %v1394_v17  ;;  %v1412_v27 = vmul.f32 0.044715, %v1396_v18  ;;  %v3588_v28 = vadd.f32 %v1363_v54, %v3488_v52 }
 0xa1d   :  { %v2672_v31 = vpop.eup %2671  ;;  %v1438_v33 = vmul.f32 0.7978846, %v1422_v21  ;;  %v1423_v34 = vadd.f32 %v1407_v22, %v3555_v63  ;;  %v1425_v35 = vadd.f32 %v1409_v23, %v3558_v5  ;;  %v1379_v37 = vmul.f32 %v3584_v24, %v3584_v24 }
 0xa1e   :  { %v2674_v38 = vpop.eup %2673  ;;  %v1462_v39 = vadd.f32 1.0, %v2672_v31  ;;  %v1440_v51 = vmul.f32 0.7978846, %v1424_v25  ;;  %v1426_v41 = vadd.f32 %v1410_v26, %v3563_v7  ;;  %v1428_v43 = vadd.f32 %v1412_v27, %v3566_v8 }
 0xa1f   :  { %v2676_v44 = vpop.eup %2675  ;;  %v1464_v45 = vadd.f32 1.0, %v2674_v38  ;;  %2687 = vtanh.f32 %v1438_v33  ;;  %v1439_v52 = vmul.f32 0.7978846, %v1423_v34  ;;  %v1441_v46 = vmul.f32 0.7978846, %v1425_v35 }
 0xa20   :  { %v2678_v54 = vpop.eup %2677  ;;  %v1478_v56 = vmul.f32 0.5, %v1462_v39  ;;  %2689 = vtanh.f32 %v1440_v51  ;;  %v1442_v50 = vmul.f32 0.7978846, %v1426_v41  ;;  %v1444_v57 = vmul.f32 0.7978846, %v1428_v43 }
 0xa21   :  { %v2680_v2 = vpop.eup %2679  ;;  %v1480_v55 = vmul.f32 0.5, %v1464_v45  ;;  %2691 = vtanh.f32 %v1439_v52  ;;  %v1395_v20 = vmul.f32 %v1379_v37, %v3584_v24  ;;  %v1381_v60 = vmul.f32 %v3588_v28, %v3588_v28 }
 0xa22   :  { %v2682_v61 = vpop.eup %2681  ;;  %v1494_v40 = vmul.f32 %v1478_v56, %v3491_v36  ;;  %v1466_v3 = vadd.f32 1.0, %v2680_v2  ;;  %2693 = vtanh.f32 %v1441_v46  ;;  %v1463_v9 = vadd.f32 1.0, %v2676_v44 }
 0xa23   :  { %v2684_v10 = vpop.eup %2683  ;;  %v1496_v11 = vmul.f32 %v1480_v55, %v3494_v42  ;;  %v1468_v12 = vadd.f32 1.0, %v2682_v61  ;;  %2695 = vtanh.f32 %v1442_v50  ;;  %v1411_v13 = vmul.f32 0.044715, %v1395_v20 }
 0xa24   :  { %v2686_v47 = vpop.eup %2685  ;;  %v1482_v49 = vmul.f32 0.5, %v1466_v3  ;;  %2697 = vtanh.f32 %v1444_v57  ;;  %v1397_v14 = vmul.f32 %v1381_v60, %v3588_v28  ;;  %v1467_v15 = vadd.f32 1.0, %v2684_v10 }
 0xa25   :  { %v1484_v16 = vmul.f32 0.5, %v1468_v12  ;;  %v1427_v17 = vadd.f32 %v1411_v13, %v3584_v24  ;;  %v1479_v18 = vmul.f32 0.5, %v1463_v9  ;;  %v1465_v36 = vadd.f32 1.0, %v2678_v54 }
 0xa26   :  { %v1498_v21 = vmul.f32 %v1482_v49, %v3507_v58  ;;  %v1413_v22 = vmul.f32 0.044715, %v1397_v14  ;;  %v1483_v23 = vmul.f32 0.5, %v1467_v15  ;;  %v1469_v25 = vadd.f32 1.0, %v2686_v47 }
 0xa27   :  { %v1500_v42 = vmul.f32 %v1484_v16, %v3510_v30  ;;  %v1443_v26 = vmul.f32 0.7978846, %v1427_v17  ;;  %v1495_v27 = vmul.f32 %v1479_v18, %v3497_v4  ;;  %v1481_v31 = vmul.f32 0.5, %v1465_v36 }
 0xa28   :  { %v1510_v33 = vpack.c.bf16 %v1498_v21, %v1494_v40  ;;  %v1429_v34 = vadd.f32 %v1413_v22, %v3588_v28  ;;  %v1499_v35 = vmul.f32 %v1483_v23, %v3517_v59  ;;  %v1485_v37 = vmul.f32 0.5, %v1469_v25  ;;  %v2202_v21 = vld [vmem:[#allocation19] ss:$0 sm:$0xff] }
 0xa29   :  { %v2688_v38 = vpop.eup %2687  ;;  %v1512_v39 = vpack.c.bf16 %v1500_v42, %v1496_v11  ;;  %2699 = vtanh.f32 %v1443_v26  ;;  %v1497_v58 = vmul.f32 %v1481_v31, %v3500_v19 }
 0xa2a   :  { %v2690_v51 = vpop.eup %2689  ;;  %v1445_v41 = vmul.f32 0.7978846, %v1429_v34  ;;  %v1511_v43 = vpack.c.bf16 %v1499_v35, %v1495_v27  ;;  %v1501_v30 = vmul.f32 %v1485_v37, %v3520_v6  ;;  %v1470_v44 = vadd.f32 1.0, %v2688_v38 }
 0xa2b   :  { %v2692_v45 = vpop.eup %2691  ;;  %v1472_v4 = vadd.f32 1.0, %v2690_v51 }
 0xa2c   :  { %v2694_v52 = vpop.eup %2693  ;;  %2701 = vtanh.f32 %v1445_v41  ;;  %1813 = vmatprep.mubr.bf16.mxu1 %v1511_v43  ;;  %v1513_v46 = vpack.c.bf16 %v1501_v30, %v1497_v58  ;;  %v1486_v50 = vmul.f32 0.5, %v1470_v44  ;;  %v1471_v2 = vadd.f32 1.0, %v2692_v45 }
 0xa2d   :  { %v2696_v54 = vpop.eup %2695  ;;  %1814 = vmatmul.mubr.bf16.vlgmr.msra.gmra.mrb[28].mxu1 %v1510_v33  ;;  %v1488_v57 = vmul.f32 0.5, %v1472_v4  ;;  %v1473_v40 = vadd.f32 1.0, %v2694_v52 }
 0xa2e   :  { %v2698_v59 = vpop.eup %2697  ;;  %1862 = vmatprep.mubr.bf16.mxu0 %v1513_v46  ;;  %v1474_v56 = vadd.f32 1.0, %v2696_v54  ;;  %v1502_v6 = vmul.f32 %v1486_v50, %v3547_v29  ;;  %v1487_v11 = vmul.f32 0.5, %v1471_v2 }
 0xa2f   :  { %1863 = vmatmul.mubr.bf16.vlgmr.msra.gmra.mrb[20].mxu0 %v1512_v39  ;;  %v1476_v19 = vadd.f32 1.0, %v2698_v59  ;;  %v1504_v3 = vmul.f32 %v1488_v57, %v3550_v62  ;;  %v1489_v15 = vmul.f32 0.5, %v1473_v40 }
 0xa30   :  { %v1490_v55 = vmul.f32 0.5, %v1474_v56  ;;  %v1503_v16 = vmul.f32 %v1487_v11, %v3555_v63 }
 0xa31   :  { %v1492_v20 = vmul.f32 0.5, %v1476_v19  ;;  %v1505_v18 = vmul.f32 %v1489_v15, %v3558_v5 }
 0xa32   :  { %v1506_v60 = vmul.f32 %v1490_v55, %v3563_v7 }
 0xa33   :  { %v2700_v61 = vpop.eup %2699  ;;  %v1508_v9 = vmul.f32 %v1492_v20, %v3566_v8 }
 0xa34   :  { %v1475_v10 = vadd.f32 1.0, %v2700_v61  ;;  %v1514_v12 = vpack.c.bf16 %v1506_v60, %v1502_v6 }
 0xa35   :  { %v1516_v13 = vpack.c.bf16 %v1508_v9, %v1504_v3 }
 0xa36   :  { %v2702_v47 = vpop.eup %2701  ;;  %v1491_v49 = vmul.f32 0.5, %v1475_v10 }
 0xa37   :  { %v1477_v14 = vadd.f32 1.0, %v2702_v47 }
 0xa38   :  { %v1507_v29 = vmul.f32 %v1491_v49, %v3584_v24 }
 0xa39   :  { %v1493_v17 = vmul.f32 0.5, %v1477_v14 }
 0xa3a   :  { %v1515_v7 = vpack.c.bf16 %v1507_v29, %v1503_v16 }
 0xa3b   :  { %v1509_v62 = vmul.f32 %v1493_v17, %v3588_v28 }
 0xa3c   :  { %1821 = vmatprep.mubr.bf16.mxu1 %v1515_v7 }
 0xa3d   :  { %v1517_v8 = vpack.c.bf16 %v1509_v62, %v1505_v18  ;;  %1822 = vmatmul.mubr.bf16.gmra.mrb[32].mxu1 %v1514_v12  ;;  %v2235_v18 = vld [vmem:[#allocation20] ss:$0 sm:$0xff] }
 0xa3e   :  { %2480 = vmatprep.mubr.msk.bf16.mxu1 %vm3055_vm0, %v3054_v32 }
 0xa3f   :  { %1870 = vmatprep.mubr.bf16.mxu0 %v1517_v8 }
 0xa40   :  { %1871 = vmatmul.mubr.bf16.gmra.mrb[24].mxu0 %v1516_v13 }
 0xb00   :  { %v2320_v36 = vpop.f32.mrb[28].mxu1 }
 0xb01   :  { %v2321_v22 = vpop.f32.mrb[29].mxu1 }
 0xb02   :  { %v2348_v63 = vpop.f32.mrb[20].mxu0  ;;  %v2322_v23 = vadd.f32 %v2321_v22, %v2320_v36  ;;  %v2323_v24 = vpop.f32.mrb[30].mxu1 }
 0xb03   :  { %v2349_v25 = vpop.f32.mrb[21].mxu0  ;;  %v2324_v42 = vpop.f32.mrb[31].mxu1 }
 0xb04   :  { %v1816_v26 = vadd.f32 %v2322_v23, %v2202_v21  ;;  %v2350_v5 = vadd.f32 %v2349_v25, %v2348_v63  ;;  %v2351_v27 = vpop.f32.mrb[22].mxu0  ;;  %v2325_v28 = vadd.f32 %v2324_v42, %v2323_v24  ;;  %v2236_v24 = vld [vmem:[#allocation22] ss:$0 sm:$0xff] }
 0xb05   :  { %v2352_v31 = vpop.f32.mrb[23].mxu0 }
 0xb06   :  { %v1865_v33 = vadd.f32 %v2350_v5, %v1816_v26  ;;  %v1819_v34 = vadd.f32 %v2325_v28, %v2202_v21  ;;  %v2353_v35 = vadd.f32 %v2352_v31, %v2351_v27 }
 0xb08   :  { %v1868_v37 = vadd.f32 %v2353_v35, %v1819_v34  ;;  %v1879_v38 = vadd.f32 %v1865_v33, %v3458_v48 }
 0xb0a   :  { %1885 = vadd.xlane.f32.xlu0 %v1879_v38  ;;  %v1880_v39 = vadd.f32 %v1868_v37, %v3460_v53 }
 0xb0c   :  { %1887 = vadd.xlane.f32.xlu1 %v1880_v39 }
 0xb10   :  { %v2326_v58 = vpop.f32.mrb[32].mxu1 }
 0xb11   :  { %v2327_v51 = vpop.f32.mrb[33].mxu1 }
 0xb12   :  { %v2328_v41 = vadd.f32 %v2327_v51, %v2326_v58  ;;  %v2329_v43 = vpop.f32.mrb[34].mxu1 }
 0xb13   :  { %v2354_v30 = vpop.f32.mrb[24].mxu0  ;;  %v2330_v44 = vpop.f32.mrb[35].mxu1 }
 0xb14   :  { %v1824_v45 = vadd.f32 %v2328_v41, %v2202_v21  ;;  %v2355_v4 = vpop.f32.mrb[25].mxu0  ;;  %v2331_v52 = vadd.f32 %v2330_v44, %v2329_v43  ;;  %v1949_v43 = vld [vmem:[#allocation2] sm:$0xf]  ;;  %v2640_v44 = vld [vmem:[%s3721_s2 + $0x8] sm:$0xff]  }
 0xb15   :  { %v2356_v46 = vadd.f32 %v2355_v4, %v2354_v30  ;;  %v2357_v54 = vpop.f32.mrb[26].mxu0  ;;  %v2639_v30 = vld [vmem:[%s3721_s2] sm:$0xff]   ;;  %v2642_v4 = vld [vmem:[%s3721_s2 + $0x18] sm:$0xff]  }
 0xb16   :  { %v1827_v59 = vadd.f32 %v2331_v52, %v2202_v21  ;;  %v2358_v56 = vpop.f32.mrb[27].mxu0  ;;  %v2643_v52 = vld [vmem:[%s3721_s2 + $0x20] sm:$0xff]  }
 0xb17   :  { %v1873_v50 = vadd.f32 %v2356_v46, %v1824_v45  ;;  %v2359_v19 = vadd.f32 %v2358_v56, %v2357_v54  ;;  %v2641_v45 = vld [vmem:[%s3721_s2 + $0x10] sm:$0xff]   ;;  %v2644_v46 = vld [vmem:[%s3721_s2 + $0x28] sm:$0xff]  }
 0xb18   :  { %v2645_v54 = vld [vmem:[%s3721_s2 + $0x30] sm:$0xff]  }
 0xb19   :  { %v1876_v48 = vadd.f32 %v2359_v19, %v1827_v59  ;;  %v1881_v57 = vadd.f32 %v1873_v50, %v3468_v1  ;;  %v2646_v59 = vld [vmem:[%s3721_s2 + $0x38] sm:$0xff]  }
 0xb1b   :  { %1889 = vadd.xlane.f32.xlu0 %v1881_v57  ;;  %v1882_v53 = vadd.f32 %v1876_v48, %v3466_v0 }
 0xb1d   :  { %1891 = vadd.xlane.f32.xlu1 %v1882_v53 }
 0xb97   :  { %v1886_v2 = vpop.xlane.xlu0 %1885 }
 0xb98   :  { %v1893_v55 = vmul.f32 0.0078125, %v1886_v2 }
 0xb99   :  { %v1888_v20 = vpop.xlane.xlu1 %1887 }
 0xb9a   :  { %v1897_v6 = vsub.f32 %v1879_v38, %v1893_v55  ;;  %v1894_v60 = vmul.f32 0.0078125, %v1888_v20 }
 0xb9c   :  { %v1898_v61 = vsub.f32 %v1880_v39, %v1894_v60  ;;  %v1901_v40 = vmul.f32 %v1897_v6, %v1897_v6 }
 0xb9e   :  { %1905 = vadd.xlane.f32.xlu0 %v1901_v40  ;;  %v1902_v3 = vmul.f32 %v1898_v61, %v1898_v61 }
 0xba0   :  { %1907 = vadd.xlane.f32.xlu1 %v1902_v3 }
 0xba8   :  { %v1890_v9 = vpop.xlane.xlu0 %1889 }
 0xba9   :  { %v1895_v10 = vmul.f32 0.0078125, %v1890_v9 }
 0xbaa   :  { %v1892_v11 = vpop.xlane.xlu1 %1891 }
 0xbab   :  { %v1899_v12 = vsub.f32 %v1881_v57, %v1895_v10  ;;  %v1896_v13 = vmul.f32 0.0078125, %v1892_v11 }
 0xbad   :  { %v1900_v1 = vsub.f32 %v1882_v53, %v1896_v13  ;;  %v1903_v47 = vmul.f32 %v1899_v12, %v1899_v12  ;;  %v2238_v53 = vld [vmem:[%s3722_s0] ss:$0 sm:$0xff] }
 0xbaf   :  { %1909 = vadd.xlane.f32.xlu0 %v1903_v47  ;;  %v1904_v0 = vmul.f32 %v1900_v1, %v1900_v1 }
 0xbb1   :  { %1911 = vadd.xlane.f32.xlu1 %v1904_v0 }
 0xc2b   :  { %v1906_v49 = vpop.xlane.xlu0 %1905 }
 0xc2c   :  { %v1913_v14 = vmul.f32 0.0078125, %v1906_v49 }
 0xc2d   :  { %v1908_v15 = vpop.xlane.xlu1 %1907 }
 0xc2e   :  { %v1917_v16 = vadd.f32 1e-05, %v1913_v14  ;;  %v1914_v29 = vmul.f32 0.0078125, %v1908_v15 }
 0xc30   :  { %2703 = vrsqrt.f32 %v1917_v16  ;;  %v1918_v17 = vadd.f32 1e-05, %v1914_v29 }
 0xc32   :  { %2705 = vrsqrt.f32 %v1918_v17 }
 0xc3a   :  { %v2704_v7 = vpop.eup %2703 }
 0xc3b   :  { %v1925_v62 = vmul.f32 %v2704_v7, %v1897_v6 }
 0xc3c   :  { %v2706_v8 = vpop.eup %2705  ;;  %v1910_v36 = vpop.xlane.xlu0 %1909 }
 0xc3d   :  { %v1926_v21 = vmul.f32 %v2706_v8, %v1898_v61  ;;  %v1915_v22 = vmul.f32 0.0078125, %v1910_v36  ;;  %v1935_v63 = vmul.f32 %v2235_v18, %v1925_v62 }
 0xc3e   :  { %v1912_v23 = vpop.xlane.xlu1 %1911 }
 0xc3f   :  { %v1919_v25 = vadd.f32 1e-05, %v1915_v22  ;;  %v1916_v42 = vmul.f32 0.0078125, %v1912_v23  ;;  %v1936_v26 = vmul.f32 %v2235_v18, %v1926_v21  ;;  %v1945_v27 = vadd.f32 %v2236_v24, %v1935_v63 }
 0xc41   :  { %2707 = vrsqrt.f32 %v1919_v25  ;;  %v1920_v5 = vadd.f32 1e-05, %v1916_v42  ;;  %v1946_v28 = vadd.f32 %v2236_v24, %v1936_v26 }
 0xc43   :  { %2709 = vrsqrt.f32 %v1920_v5  ;;  %v1950_v31 = vpack.c.bf16 %v1946_v28, %v1945_v27 }
 0xc45   :  { %2477 = vmatpush3.bf16.msra.mxu1 %v1950_v31 }
 0xc46   :  { %2478 = vmatprep.subr.bf16.mxu1 %v3054_v32 }
 0xc4b   :  { %v2708_v33 = vpop.eup %2707 }
 0xc4c   :  { %v1927_v34 = vmul.f32 %v2708_v33, %v1899_v12 }
 0xc4d   :  { %v2710_v35 = vpop.eup %2709 }
 0xc4e   :  { %v1928_v37 = vmul.f32 %v2710_v35, %v1900_v1  ;;  %v1937_v38 = vmul.f32 %v2235_v18, %v1927_v34 }
 0xc50   :  { %v1938_v39 = vmul.f32 %v2235_v18, %v1928_v37  ;;  %v1947_v58 = vadd.f32 %v2236_v24, %v1937_v38 }
 0xc52   :  { %v1948_v51 = vadd.f32 %v2236_v24, %v1938_v39 }
 0xc54   :  { %v1951_v41 = vpack.c.bf16 %v1948_v51, %v1947_v58 }
 0xc56   :  { %2479 = vmatpush3.bf16.msra.mxu1 %v1951_v41 }
 0xc57   :  { %2484 = vmatprep.subr.bf16.mxu1 %v3054_v32 }
 0xc59   :  { %2481 = vmatmul.mubr.msk.bf16.vlgmr.msra.gmra.mrb[36].mxu1 %vm1952_vm2, %v1949_v43 }
 0xc5a   :  { %2485 = vmatpush3.bf16.msra.mxu1 %v2639_v30  ;;  %2500 = vmatprep.mubr.msk.bf16.mxu1 %vm3055_vm0, %v3054_v32 }
 0xc5b   :  { %2486 = vmatprep.subr.bf16.mxu1 %v3054_v32 }
 0xc5e   :  { %2487 = vmatpush3.bf16.msra.mxu1 %v2640_v44 }
 0xc5f   :  { %2488 = vmatprep.subr.bf16.mxu1 %v3054_v32 }
 0xc62   :  { %2489 = vmatpush3.bf16.msra.mxu1 %v2641_v45 }
 0xc63   :  { %2490 = vmatprep.subr.bf16.mxu1 %v3054_v32 }
 0xc66   :  { %2491 = vmatpush3.bf16.msra.mxu1 %v2642_v4 }
 0xc67   :  { %2492 = vmatprep.subr.bf16.mxu1 %v3054_v32 }
 0xc6a   :  { %2493 = vmatpush3.bf16.msra.mxu1 %v2643_v52 }
 0xc6b   :  { %2494 = vmatprep.subr.bf16.mxu1 %v3054_v32 }
 0xc6e   :  { %2495 = vmatpush3.bf16.msra.mxu1 %v2644_v46 }
 0xc6f   :  { %2496 = vmatprep.subr.bf16.mxu1 %v3054_v32 }
 0xc72   :  { %2497 = vmatpush3.bf16.msra.mxu1 %v2645_v54 }
 0xc73   :  { %2498 = vmatprep.subr.bf16.mxu1 %v3054_v32 }
 0xc76   :  { %2499 = vmatpush3.bf16.msra.mxu1 %v2646_v59 }
 0xd2c   :  { %v1990_v56 = vpop.f32.mrb[36].mxu1 }
 0xd2d   :  { %v1996_v50 = vpack.c.bf16 %v1990_v56, %v1990_v56  ;;  %v2482_v19 = vpop.f32.mrb[37].mxu1 }
 0xd2e   :  { %v1993_v48 = vpop.f32.mrb[38].mxu1 }
 0xd2f   :  { %v2483_v57 = vpop.f32.mrb[39].mxu1  ;;  %2501 = vmatmul.mubr.bf16.vlgmr.msra.gmra.mrb[40].mxu1 %v1996_v50 }
 0xe02   :  { %v2102_v2 = vpop.f32.mrb[40].mxu1 }
 0xe03   :  { %v2103_v55 = vadd.f32 %v2238_v53, %v2102_v2  ;;  %v2502_v32 = vpop.f32.mrb[41].mxu1 }
 0xe04   :  { %v2105_v20 = vpop.f32.mrb[42].mxu1 }
 0xe05   :  { %2108 = vst [vmem:[#allocation23] sm:$0xff] %v2103_v55  ;;  %v2503_v6 = vpop.f32.mrb[43].mxu1 }
 0xe06   :  { %3008 = shalt.err (!%p3005_p10)
}
 0xe07   :  { %s3723_s9 = sld [smem:[#allocation41_spill]] }
 0xe0d   :  { %s3009_s24 = scalar_lea.hbm %s3723_s9, 128 }
 0xe0e   :  { %p3010_p11 = scmp.ne.s32.totalorder %s3723_s9, %s3009_s24  ;;  %p3013_p12 = scmp.lt.u32.totalorder %s3009_s24, %s3723_s9 }
 0xe10   :  { %p3015_p13 = pnand %p3013_p12, %p3010_p11 }
 0xe12   :  { %3018 = shalt.err (!%p3015_p13)
}
 0xe13   :  { %2118 = dma.vmem_to_hbm [thread:$0]  %s2116_s1, 128, %s3723_s9, [#allocation4]  }
 0xe14   :  { %3033 = dma.done.wait [#allocation4], 128  }
 0xe15   :  { %3034 = vsyncadd [#allocation4], 4294967168 }
 0xe16   :  { %2122 = vsyncpa [#allocation3], 1 }
 0xe17   :  { %2123 = vsyncpa [#allocation6], 1 }
 0xe18   :  { %2124 = vsyncpa [#allocation9], 1 }
 0xe19   :  { %2125 = vsyncpa [#allocation12], 1 }
 0xe1a   :  { %2126 = vsyncpa [#allocation15], 1 }
 0xe1b   :  { %2127 = vsyncpa [#allocation18], 1 }
 0xe1c   :  { %2128 = vsyncpa [#allocation21], 1 }
 0xe1d   :  { %2129 = vsyncpa [#allocation4], 1 }

</bundles_post_ra>
